<compile_context>
chip_gen: v7x
topology: tpu7x:2x2x1
jax: 0.10.0
libtpu: 0.0.40
codegen_flags: <defaults>
</compile_context>

<pallas_src>
import functools

import jax
import jax.numpy as jnp
from jax.experimental import pallas as pl
from jax.experimental.pallas import tpu as pltpu


def _round_up(v, m):
    return ((v + m - 1) // m) * m


# ------------------------- fused forward kernel (batch-tile grid) ------------------------- #
def _robustlog_fused_kernel(x_ref, *refs, num_layers, hidden_size, seq_len):
    """refs = (w_ih_0, w_hh_0, bias_0, ..., w_ih_{L-1}, w_hh_{L-1}, bias_{L-1},
               w_fc, b_fc, out_ref, xproj_scratch).

    x_ref:    (T, B, D0)        sequence-major input, batch tile of 8
    w_ih_l:   (d_l, 4H)         W_ih^T
    w_hh_l:   (H, 4H)           W_hh^T
    bias_l:   (1, 4H)           b_ih + b_hh
    w_fc:     (H, K_pad)        lane-padded FC weight
    b_fc:     (1, K_pad)
    out_ref:  (B, K_pad)
    xproj:    (T, B, 4H)        VMEM scratch for the precomputed layer-0 projection
    """
    w_ih = [refs[3 * l] for l in range(num_layers)]
    w_hh = [refs[3 * l + 1] for l in range(num_layers)]
    bias = [refs[3 * l + 2] for l in range(num_layers)]
    wfc_ref = refs[3 * num_layers]
    bfc_ref = refs[3 * num_layers + 1]
    out_ref = refs[3 * num_layers + 2]
    xproj_ref = refs[3 * num_layers + 3]

    H = hidden_size
    G = 4 * H
    T = seq_len
    B = x_ref.shape[1]
    D0 = x_ref.shape[2]

    # Explicit single-pass MXU regardless of any global default_matmul_precision.
    dot_kw = dict(preferred_element_type=jnp.float32,
                  precision=jax.lax.Precision.DEFAULT)

    # (1) Layer-0 input projection + bias for ALL timesteps: one big MXU matmul,
    #     removed from the serialized per-step critical path.
    x_all = x_ref[...].reshape(T * B, D0)                       # leading-dim merge, layout no-op
    xproj_ref[...] = (jnp.dot(x_all, w_ih[0][...], **dot_kw)
                      + bias[0][...]).reshape(T, B, G)

    # Pre-broadcast biases of layers > 0 once (JAX does not CSE broadcast_in_dim;
    # inside the unrolled loop it would be emitted T*(L-1) times).
    bias_b = [None] + [jnp.broadcast_to(bias[l][...], (B, G))
                       for l in range(1, num_layers)]

    def gates_to_hc(gates, c_prev):
        # Full-width activations over the dense (B, 4H) tile (2 EUP pushes),
        # then cheap static lane slices for the four gates.
        sg = jax.nn.sigmoid(gates)
        th = jnp.tanh(gates)
        i_g = sg[:, 0 * H:1 * H]
        f_g = sg[:, 1 * H:2 * H]
        g_g = th[:, 2 * H:3 * H]
        o_g = sg[:, 3 * H:4 * H]
        c_new = i_g * g_g if c_prev is None else f_g * c_prev + i_g * g_g
        h_new = o_g * jnp.tanh(c_new)
        return h_new, c_new

    # (2) Peeled t = 0: h0 = c0 = 0 -> skip the h @ W_hh matmul and the f*c term.
    hs, cs = [], []
    x_in = None
    for l in range(num_layers):
        if l == 0:
            gates = xproj_ref[0]
        else:
            gates = jnp.dot(x_in, w_ih[l][...], **dot_kw) + bias_b[l]
        h_new, c_new = gates_to_hc(gates, None)
        hs.append(h_new)
        cs.append(c_new)
        x_in = h_new

    # (3) Remaining timesteps. Weight Refs are read inside the step (VMEM -> MXU)
    #     rather than hoisted into values pinned across the whole unrolled loop.
    def step(t, carry):
        hs, cs = carry
        new_hs, new_cs = [], []
        x_in = None
        for l in range(num_layers):
            if l == 0:
                gates = xproj_ref[t] + jnp.dot(hs[0], w_hh[0][...], **dot_kw)
            else:
                gates = (jnp.dot(x_in, w_ih[l][...], **dot_kw)
                         + jnp.dot(hs[l], w_hh[l][...], **dot_kw)
                         + bias_b[l])
            h_new, c_new = gates_to_hc(gates, cs[l])
            new_hs.append(h_new)
            new_cs.append(c_new)
            x_in = h_new
        return tuple(new_hs), tuple(new_cs)

    # Bounded unroll: full for small T, capped for long windows to avoid vreg spills.
    unroll = True if T <= 16 else 8
    hs, _ = jax.lax.fori_loop(1, T, step, (tuple(hs), tuple(cs)), unroll=unroll)

    # (4) Fused FC head on the last hidden state of the top layer; K_pad = 128 lanes
    #     -> unmasked dense store.
    out_ref[...] = (jnp.dot(hs[-1], wfc_ref[...], **dot_kw)
                    + bfc_ref[...]).astype(out_ref.dtype)


# --------------------------------- wrapper / glue --------------------------------- #
def robustlog_forward(features, params, hidden_size):
    """features[0]: (B, T, input_size) batch-first, like the PyTorch module."""
    x = features[0]
    B, T, D = x.shape
    H = hidden_size
    G = 4 * H
    lstm_params = params["lstm"]
    num_layers = len(lstm_params)
    K = params["fc_b"].shape[0]

    B_TILE = 8                                   # one f32 sublane group per batch tile
    B_pad = _round_up(B, B_TILE)
    K_pad = _round_up(K, 128)

    x_p = jnp.pad(x.astype(jnp.float32), ((0, B_pad - B), (0, 0), (0, 0)))
    x_tbd = jnp.transpose(x_p, (1, 0, 2))                       # (T, B_pad, D)

    w_fc = jnp.pad(params["fc_w"], ((0, 0), (0, K_pad - K)))    # (H, K_pad)
    b_fc = jnp.pad(params["fc_b"], (0, K_pad - K)).reshape(1, K_pad)

    args = [x_tbd]
    in_specs = [pl.BlockSpec((T, B_TILE, D), lambda b: (0, b, 0))]
    for l, lp in enumerate(lstm_params):
        d_l = D if l == 0 else H
        args += [lp["w_ih_t"], lp["w_hh_t"], lp["bias"]]
        in_specs += [pl.BlockSpec((d_l, G), lambda b: (0, 0)),
                     pl.BlockSpec((H, G), lambda b: (0, 0)),
                     pl.BlockSpec((1, G), lambda b: (0, 0))]
    args += [w_fc, b_fc]
    in_specs += [pl.BlockSpec((H, K_pad), lambda b: (0, 0)),
                 pl.BlockSpec((1, K_pad), lambda b: (0, 0))]

    kernel = functools.partial(
        _robustlog_fused_kernel,
        num_layers=num_layers, hidden_size=H, seq_len=T)

    out_pad = pl.pallas_call(
        kernel,
        out_shape=jax.ShapeDtypeStruct((B_pad, K_pad), jnp.float32),
        grid_spec=pltpu.PrefetchScalarGridSpec(
            num_scalar_prefetch=0,
            grid=(B_pad // B_TILE,),                 # shards over 2 TCs on v7x when B > 8
            in_specs=in_specs,
            out_specs=pl.BlockSpec((B_TILE, K_pad), lambda b: (b, 0)),
            scratch_shapes=[pltpu.VMEM((T, B_TILE, G), jnp.float32)]),
        compiler_params=pltpu.CompilerParams(
            dimension_semantics=("parallel",)),
    )(*args)
    # Padded batch rows (B..B_pad-1) carry bias-driven junk; slice them off here.
    return out_pad[:B, :K]


def init_robustlog_params(key, input_size, hidden_size, num_layers, num_keys):
    """Deterministic init mimicking PyTorch's U(-1/sqrt(H), 1/sqrt(H)); weights are
    pre-transposed for the kernel layout (gates = x @ W_ih^T' form)."""
    bound = 1.0 / (float(hidden_size) ** 0.5)
    params = {"lstm": []}
    for layer in range(num_layers):
        d_in = input_size if layer == 0 else hidden_size
        key, k1, k2, k3, k4 = jax.random.split(key, 5)
        w_ih = jax.random.uniform(k1, (4 * hidden_size, d_in), jnp.float32, -bound, bound)
        w_hh = jax.random.uniform(k2, (4 * hidden_size, hidden_size), jnp.float32, -bound, bound)
        b_ih = jax.random.uniform(k3, (4 * hidden_size,), jnp.float32, -bound, bound)
        b_hh = jax.random.uniform(k4, (4 * hidden_size,), jnp.float32, -bound, bound)
        params["lstm"].append({
            "w_ih_t": w_ih.T,                                    # (d_in, 4H)
            "w_hh_t": w_hh.T,                                    # (H, 4H)
            "bias": (b_ih + b_hh).reshape(1, 4 * hidden_size),   # (1, 4H)
        })
    key, k5, k6 = jax.random.split(key, 3)
    params["fc_w"] = jax.random.uniform(k5, (num_keys, hidden_size), jnp.float32,
                                        -bound, bound).T          # (H, K)
    params["fc_b"] = jax.random.uniform(k6, (num_keys,), jnp.float32, -bound, bound)
    return params


# -------------------------------- pure-JAX reference ------------------------------- #
def _reference_forward(features, params, hidden_size):
    x = features[0]                      # (B, T, D)
    B = x.shape[0]
    H = hidden_size
    seq = jnp.transpose(x, (1, 0, 2))    # (T, B, D)
    for lp in params["lstm"]:
        w_ih, w_hh, bias = lp["w_ih_t"], lp["w_hh_t"], lp["bias"][0]

        def step(carry, x_t, w_ih=w_ih, w_hh=w_hh, bias=bias):
            h, c = carry
            gates = x_t @ w_ih + h @ w_hh + bias
            i = jax.nn.sigmoid(gates[:, 0 * H:1 * H])
            f = jax.nn.sigmoid(gates[:, 1 * H:2 * H])
            g = jnp.tanh(gates[:, 2 * H:3 * H])
            o = jax.nn.sigmoid(gates[:, 3 * H:4 * H])
            c = f * c + i * g
            h = o * jnp.tanh(c)
            return (h, c), h

        init = (jnp.zeros((B, H), jnp.float32), jnp.zeros((B, H), jnp.float32))
        _, hs = jax.lax.scan(step, init, seq)
        seq = hs
    return seq[-1] @ params["fc_w"] + params["fc_b"]


# --------------------------------------- main -------------------------------------- #
if __name__ == "__main__":
    # Small shapes consistent with robustlog's forward.
    B, T = 2, 8
    input_size, hidden_size, num_layers, num_keys = 16, 32, 2, 10

    key = jax.random.PRNGKey(0)
    key, k_x = jax.random.split(key)
    x = jax.random.normal(k_x, (B, T, input_size), jnp.float32)
    features = (x,)

    params = init_robustlog_params(key, input_size, hidden_size, num_layers, num_keys)

    out = jax.block_until_ready(robustlog_forward(features, params, hidden_size))
    ref = jax.block_until_ready(_reference_forward(features, params, hidden_size))

    assert out.shape == (B, num_keys)
    assert jnp.allclose(out, ref, atol=2e-3, rtol=2e-3), "Pallas output mismatch vs reference"

    print("KERNEL_OK")
</pallas_src>

<mosaic_0001>
module attributes {stable_mosaic.version = 11 : i64} {
  func.func @_robustlog_fused_kernel(%arg0: i32, %arg1: memref<8x8x16xf32, #tpu.memory_space<vmem>>, %arg2: memref<16x128xf32, #tpu.memory_space<vmem>>, %arg3: memref<32x128xf32, #tpu.memory_space<vmem>>, %arg4: memref<1x128xf32, #tpu.memory_space<vmem>>, %arg5: memref<32x128xf32, #tpu.memory_space<vmem>>, %arg6: memref<32x128xf32, #tpu.memory_space<vmem>>, %arg7: memref<1x128xf32, #tpu.memory_space<vmem>>, %arg8: memref<32x128xf32, #tpu.memory_space<vmem>>, %arg9: memref<1x128xf32, #tpu.memory_space<vmem>>, %arg10: memref<8x128xf32, #tpu.memory_space<vmem>>, %arg11: memref<8x8x128xf32, #tpu.memory_space<vmem>>) attributes {dimension_semantics = [#tpu.dimension_semantics<parallel>], iteration_bounds = array<i64: 1>, scalar_prefetch = 0 : i64, scratch_operands = 1 : i64, tpu.core_type = #tpu.core_type<tc>, window_params = [{transform_indices = @transform_0, window_bounds = array<i64: 8, 8, 16>}, {pipeline_mode = #tpu.pipeline_mode<synchronous>, transform_indices = @transform_1, window_bounds = array<i64: 16, 128>}, {pipeline_mode = #tpu.pipeline_mode<synchronous>, transform_indices = @transform_2, window_bounds = array<i64: 32, 128>}, {pipeline_mode = #tpu.pipeline_mode<synchronous>, transform_indices = @transform_3, window_bounds = array<i64: 1, 128>}, {pipeline_mode = #tpu.pipeline_mode<synchronous>, transform_indices = @transform_4, window_bounds = array<i64: 32, 128>}, {pipeline_mode = #tpu.pipeline_mode<synchronous>, transform_indices = @transform_5, window_bounds = array<i64: 32, 128>}, {pipeline_mode = #tpu.pipeline_mode<synchronous>, transform_indices = @transform_6, window_bounds = array<i64: 1, 128>}, {pipeline_mode = #tpu.pipeline_mode<synchronous>, transform_indices = @transform_7, window_bounds = array<i64: 32, 128>}, {pipeline_mode = #tpu.pipeline_mode<synchronous>, transform_indices = @transform_8, window_bounds = array<i64: 1, 128>}, {transform_indices = @transform_9, window_bounds = array<i64: 8, 128>}]} {
    %c0 = arith.constant 0 : index
    %c0_0 = arith.constant 0 : index
    %c0_1 = arith.constant 0 : index
    %0 = vector.load %arg1[%c0, %c0_0, %c0_1] : memref<8x8x16xf32, #tpu.memory_space<vmem>>, vector<8x8x16xf32>
    %1 = vector.shape_cast %0 : vector<8x8x16xf32> to vector<64x16xf32>
    %c0_2 = arith.constant 0 : index
    %c0_3 = arith.constant 0 : index
    %2 = vector.load %arg2[%c0_2, %c0_3] : memref<16x128xf32, #tpu.memory_space<vmem>>, vector<16x128xf32>
    %cst = arith.constant dense<0.000000e+00> : vector<64x128xf32>
    %3 = tpu.matmul %1, %2, %cst {dimension_numbers = #tpu.dot_dimension_numbers<[1], [0], [0], [1], [0, 0, 1, 1], [], []>} : vector<64x16xf32>, vector<16x128xf32>, vector<64x128xf32> -> vector<64x128xf32>
    %c0_4 = arith.constant 0 : index
    %c0_5 = arith.constant 0 : index
    %4 = vector.load %arg4[%c0_4, %c0_5] : memref<1x128xf32, #tpu.memory_space<vmem>>, vector<1x128xf32>
    %5 = vector.broadcast %4 : vector<1x128xf32> to vector<64x128xf32>
    %6 = arith.addf %3, %5 : vector<64x128xf32>
    %7 = vector.shape_cast %6 : vector<64x128xf32> to vector<8x8x128xf32>
    %c0_6 = arith.constant 0 : index
    %c0_7 = arith.constant 0 : index
    %c0_8 = arith.constant 0 : index
    %8 = vector.load %arg11[%c0_6, %c0_7, %c0_8] : memref<8x8x128xf32, #tpu.memory_space<vmem>>, vector<8x8x128xf32>
    tpu.vector_store %arg11[%c0_6, %c0_7, %c0_8], %7 {strides = array<i32>} : memref<8x8x128xf32, #tpu.memory_space<vmem>>, vector<8x8x128xf32>,
    %c0_9 = arith.constant 0 : index
    %c0_10 = arith.constant 0 : index
    %9 = vector.load %arg7[%c0_9, %c0_10] : memref<1x128xf32, #tpu.memory_space<vmem>>, vector<1x128xf32>
    %10 = vector.shape_cast %9 : vector<1x128xf32> to vector<1x128xf32>
    %11 = vector.broadcast %10 : vector<1x128xf32> to vector<8x128xf32>
    %c0_11 = arith.constant 0 : index
    %c0_12 = arith.constant 0 : index
    %c0_13 = arith.constant 0 : index
    %12 = vector.load %arg11[%c0_11, %c0_12, %c0_13] : memref<8x8x128xf32, #tpu.memory_space<vmem>>, vector<1x8x128xf32>
    %13 = vector.shape_cast %12 : vector<1x8x128xf32> to vector<8x128xf32>
    %14 = arith.negf %13 : vector<8x128xf32>
    %15 = math.exp %14 : vector<8x128xf32>
    %cst_14 = arith.constant 1.000000e+00 : f32
    %16 = vector.broadcast %cst_14 : f32 to vector<8x128xf32>
    %17 = arith.addf %16, %15 : vector<8x128xf32>
    %18 = arith.divf %16, %17 : vector<8x128xf32>
    %19 = math.tanh %13 : vector<8x128xf32>
    %20 = vector.extract_strided_slice %18 {offsets = [0, 0], sizes = [8, 32], strides = [1, 1]} : vector<8x128xf32> to vector<8x32xf32>
    %21 = vector.extract_strided_slice %19 {offsets = [0, 64], sizes = [8, 32], strides = [1, 1]} : vector<8x128xf32> to vector<8x32xf32>
    %22 = vector.extract_strided_slice %18 {offsets = [0, 96], sizes = [8, 32], strides = [1, 1]} : vector<8x128xf32> to vector<8x32xf32>
    %23 = arith.mulf %20, %21 : vector<8x32xf32>
    %24 = math.tanh %23 : vector<8x32xf32>
    %25 = arith.mulf %22, %24 : vector<8x32xf32>
    %c0_15 = arith.constant 0 : index
    %c0_16 = arith.constant 0 : index
    %26 = vector.load %arg5[%c0_15, %c0_16] : memref<32x128xf32, #tpu.memory_space<vmem>>, vector<32x128xf32>
    %cst_17 = arith.constant dense<0.000000e+00> : vector<8x128xf32>
    %27 = tpu.matmul %25, %26, %cst_17 {dimension_numbers = #tpu.dot_dimension_numbers<[1], [0], [0], [1], [0, 0, 1, 1], [], []>} : vector<8x32xf32>, vector<32x128xf32>, vector<8x128xf32> -> vector<8x128xf32>
    %28 = arith.addf %27, %11 : vector<8x128xf32>
    %29 = arith.negf %28 : vector<8x128xf32>
    %30 = math.exp %29 : vector<8x128xf32>
    %cst_18 = arith.constant 1.000000e+00 : f32
    %31 = vector.broadcast %cst_18 : f32 to vector<8x128xf32>
    %32 = arith.addf %31, %30 : vector<8x128xf32>
    %33 = arith.divf %31, %32 : vector<8x128xf32>
    %34 = math.tanh %28 : vector<8x128xf32>
    %35 = vector.extract_strided_slice %33 {offsets = [0, 0], sizes = [8, 32], strides = [1, 1]} : vector<8x128xf32> to vector<8x32xf32>
    %36 = vector.extract_strided_slice %34 {offsets = [0, 64], sizes = [8, 32], strides = [1, 1]} : vector<8x128xf32> to vector<8x32xf32>
    %37 = vector.extract_strided_slice %33 {offsets = [0, 96], sizes = [8, 32], strides = [1, 1]} : vector<8x128xf32> to vector<8x32xf32>
    %38 = arith.mulf %35, %36 : vector<8x32xf32>
    %39 = math.tanh %38 : vector<8x32xf32>
    %40 = arith.mulf %37, %39 : vector<8x32xf32>
    %c1_i32 = arith.constant 1 : i32
    %41 = arith.index_cast %c1_i32 : i32 to index
    %c0_19 = arith.constant 0 : index
    %c0_20 = arith.constant 0 : index
    %42 = vector.load %arg11[%41, %c0_19, %c0_20] : memref<8x8x128xf32, #tpu.memory_space<vmem>>, vector<1x8x128xf32>
    %43 = vector.shape_cast %42 : vector<1x8x128xf32> to vector<8x128xf32>
    %c0_21 = arith.constant 0 : index
    %c0_22 = arith.constant 0 : index
    %44 = vector.load %arg3[%c0_21, %c0_22] : memref<32x128xf32, #tpu.memory_space<vmem>>, vector<32x128xf32>
    %cst_23 = arith.constant dense<0.000000e+00> : vector<8x128xf32>
    %45 = tpu.matmul %25, %44, %cst_23 {dimension_numbers = #tpu.dot_dimension_numbers<[1], [0], [0], [1], [0, 0, 1, 1], [], []>} : vector<8x32xf32>, vector<32x128xf32>, vector<8x128xf32> -> vector<8x128xf32>
    %46 = arith.addf %43, %45 : vector<8x128xf32>
    %47 = arith.negf %46 : vector<8x128xf32>
    %48 = math.exp %47 : vector<8x128xf32>
    %cst_24 = arith.constant 1.000000e+00 : f32
    %49 = vector.broadcast %cst_24 : f32 to vector<8x128xf32>
    %50 = arith.addf %49, %48 : vector<8x128xf32>
    %51 = arith.divf %49, %50 : vector<8x128xf32>
    %52 = math.tanh %46 : vector<8x128xf32>
    %53 = vector.extract_strided_slice %51 {offsets = [0, 0], sizes = [8, 32], strides = [1, 1]} : vector<8x128xf32> to vector<8x32xf32>
    %54 = vector.extract_strided_slice %51 {offsets = [0, 32], sizes = [8, 32], strides = [1, 1]} : vector<8x128xf32> to vector<8x32xf32>
    %55 = vector.extract_strided_slice %52 {offsets = [0, 64], sizes = [8, 32], strides = [1, 1]} : vector<8x128xf32> to vector<8x32xf32>
    %56 = vector.extract_strided_slice %51 {offsets = [0, 96], sizes = [8, 32], strides = [1, 1]} : vector<8x128xf32> to vector<8x32xf32>
    %57 = arith.mulf %54, %23 : vector<8x32xf32>
    %58 = arith.mulf %53, %55 : vector<8x32xf32>
    %59 = arith.addf %57, %58 : vector<8x32xf32>
    %60 = math.tanh %59 : vector<8x32xf32>
    %61 = arith.mulf %56, %60 : vector<8x32xf32>
    %c0_25 = arith.constant 0 : index
    %c0_26 = arith.constant 0 : index
    %62 = vector.load %arg5[%c0_25, %c0_26] : memref<32x128xf32, #tpu.memory_space<vmem>>, vector<32x128xf32>
    %cst_27 = arith.constant dense<0.000000e+00> : vector<8x128xf32>
    %63 = tpu.matmul %61, %62, %cst_27 {dimension_numbers = #tpu.dot_dimension_numbers<[1], [0], [0], [1], [0, 0, 1, 1], [], []>} : vector<8x32xf32>, vector<32x128xf32>, vector<8x128xf32> -> vector<8x128xf32>
    %c0_28 = arith.constant 0 : index
    %c0_29 = arith.constant 0 : index
    %64 = vector.load %arg6[%c0_28, %c0_29] : memref<32x128xf32, #tpu.memory_space<vmem>>, vector<32x128xf32>
    %cst_30 = arith.constant dense<0.000000e+00> : vector<8x128xf32>
    %65 = tpu.matmul %40, %64, %cst_30 {dimension_numbers = #tpu.dot_dimension_numbers<[1], [0], [0], [1], [0, 0, 1, 1], [], []>} : vector<8x32xf32>, vector<32x128xf32>, vector<8x128xf32> -> vector<8x128xf32>
    %66 = arith.addf %63, %65 : vector<8x128xf32>
    %67 = arith.addf %66, %11 : vector<8x128xf32>
    %68 = arith.negf %67 : vector<8x128xf32>
    %69 = math.exp %68 : vector<8x128xf32>
    %cst_31 = arith.constant 1.000000e+00 : f32
    %70 = vector.broadcast %cst_31 : f32 to vector<8x128xf32>
    %71 = arith.addf %70, %69 : vector<8x128xf32>
    %72 = arith.divf %70, %71 : vector<8x128xf32>
    %73 = math.tanh %67 : vector<8x128xf32>
    %74 = vector.extract_strided_slice %72 {offsets = [0, 0], sizes = [8, 32], strides = [1, 1]} : vector<8x128xf32> to vector<8x32xf32>
    %75 = vector.extract_strided_slice %72 {offsets = [0, 32], sizes = [8, 32], strides = [1, 1]} : vector<8x128xf32> to vector<8x32xf32>
    %76 = vector.extract_strided_slice %73 {offsets = [0, 64], sizes = [8, 32], strides = [1, 1]} : vector<8x128xf32> to vector<8x32xf32>
    %77 = vector.extract_strided_slice %72 {offsets = [0, 96], sizes = [8, 32], strides = [1, 1]} : vector<8x128xf32> to vector<8x32xf32>
    %78 = arith.mulf %75, %38 : vector<8x32xf32>
    %79 = arith.mulf %74, %76 : vector<8x32xf32>
    %80 = arith.addf %78, %79 : vector<8x32xf32>
    %81 = math.tanh %80 : vector<8x32xf32>
    %82 = arith.mulf %77, %81 : vector<8x32xf32>
    %c2_i32 = arith.constant 2 : i32
    %83 = arith.index_cast %c2_i32 : i32 to index
    %c0_32 = arith.constant 0 : index
    %c0_33 = arith.constant 0 : index
    %84 = vector.load %arg11[%83, %c0_32, %c0_33] : memref<8x8x128xf32, #tpu.memory_space<vmem>>, vector<1x8x128xf32>
    %85 = vector.shape_cast %84 : vector<1x8x128xf32> to vector<8x128xf32>
    %c0_34 = arith.constant 0 : index
    %c0_35 = arith.constant 0 : index
    %86 = vector.load %arg3[%c0_34, %c0_35] : memref<32x128xf32, #tpu.memory_space<vmem>>, vector<32x128xf32>
    %cst_36 = arith.constant dense<0.000000e+00> : vector<8x128xf32>
    %87 = tpu.matmul %61, %86, %cst_36 {dimension_numbers = #tpu.dot_dimension_numbers<[1], [0], [0], [1], [0, 0, 1, 1], [], []>} : vector<8x32xf32>, vector<32x128xf32>, vector<8x128xf32> -> vector<8x128xf32>
    %88 = arith.addf %85, %87 : vector<8x128xf32>
    %89 = arith.negf %88 : vector<8x128xf32>
    %90 = math.exp %89 : vector<8x128xf32>
    %cst_37 = arith.constant 1.000000e+00 : f32
    %91 = vector.broadcast %cst_37 : f32 to vector<8x128xf32>
    %92 = arith.addf %91, %90 : vector<8x128xf32>
    %93 = arith.divf %91, %92 : vector<8x128xf32>
    %94 = math.tanh %88 : vector<8x128xf32>
    %95 = vector.extract_strided_slice %93 {offsets = [0, 0], sizes = [8, 32], strides = [1, 1]} : vector<8x128xf32> to vector<8x32xf32>
    %96 = vector.extract_strided_slice %93 {offsets = [0, 32], sizes = [8, 32], strides = [1, 1]} : vector<8x128xf32> to vector<8x32xf32>
    %97 = vector.extract_strided_slice %94 {offsets = [0, 64], sizes = [8, 32], strides = [1, 1]} : vector<8x128xf32> to vector<8x32xf32>
    %98 = vector.extract_strided_slice %93 {offsets = [0, 96], sizes = [8, 32], strides = [1, 1]} : vector<8x128xf32> to vector<8x32xf32>
    %99 = arith.mulf %96, %59 : vector<8x32xf32>
    %100 = arith.mulf %95, %97 : vector<8x32xf32>
    %101 = arith.addf %99, %100 : vector<8x32xf32>
    %102 = math.tanh %101 : vector<8x32xf32>
    %103 = arith.mulf %98, %102 : vector<8x32xf32>
    %c0_38 = arith.constant 0 : index
    %c0_39 = arith.constant 0 : index
    %104 = vector.load %arg5[%c0_38, %c0_39] : memref<32x128xf32, #tpu.memory_space<vmem>>, vector<32x128xf32>
    %cst_40 = arith.constant dense<0.000000e+00> : vector<8x128xf32>
    %105 = tpu.matmul %103, %104, %cst_40 {dimension_numbers = #tpu.dot_dimension_numbers<[1], [0], [0], [1], [0, 0, 1, 1], [], []>} : vector<8x32xf32>, vector<32x128xf32>, vector<8x128xf32> -> vector<8x128xf32>
    %c0_41 = arith.constant 0 : index
    %c0_42 = arith.constant 0 : index
    %106 = vector.load %arg6[%c0_41, %c0_42] : memref<32x128xf32, #tpu.memory_space<vmem>>, vector<32x128xf32>
    %cst_43 = arith.constant dense<0.000000e+00> : vector<8x128xf32>
    %107 = tpu.matmul %82, %106, %cst_43 {dimension_numbers = #tpu.dot_dimension_numbers<[1], [0], [0], [1], [0, 0, 1, 1], [], []>} : vector<8x32xf32>, vector<32x128xf32>, vector<8x128xf32> -> vector<8x128xf32>
    %108 = arith.addf %105, %107 : vector<8x128xf32>
    %109 = arith.addf %108, %11 : vector<8x128xf32>
    %110 = arith.negf %109 : vector<8x128xf32>
    %111 = math.exp %110 : vector<8x128xf32>
    %cst_44 = arith.constant 1.000000e+00 : f32
    %112 = vector.broadcast %cst_44 : f32 to vector<8x128xf32>
    %113 = arith.addf %112, %111 : vector<8x128xf32>
    %114 = arith.divf %112, %113 : vector<8x128xf32>
    %115 = math.tanh %109 : vector<8x128xf32>
    %116 = vector.extract_strided_slice %114 {offsets = [0, 0], sizes = [8, 32], strides = [1, 1]} : vector<8x128xf32> to vector<8x32xf32>
    %117 = vector.extract_strided_slice %114 {offsets = [0, 32], sizes = [8, 32], strides = [1, 1]} : vector<8x128xf32> to vector<8x32xf32>
    %118 = vector.extract_strided_slice %115 {offsets = [0, 64], sizes = [8, 32], strides = [1, 1]} : vector<8x128xf32> to vector<8x32xf32>
    %119 = vector.extract_strided_slice %114 {offsets = [0, 96], sizes = [8, 32], strides = [1, 1]} : vector<8x128xf32> to vector<8x32xf32>
    %120 = arith.mulf %117, %80 : vector<8x32xf32>
    %121 = arith.mulf %116, %118 : vector<8x32xf32>
    %122 = arith.addf %120, %121 : vector<8x32xf32>
    %123 = math.tanh %122 : vector<8x32xf32>
    %124 = arith.mulf %119, %123 : vector<8x32xf32>
    %c3_i32 = arith.constant 3 : i32
    %125 = arith.index_cast %c3_i32 : i32 to index
    %c0_45 = arith.constant 0 : index
    %c0_46 = arith.constant 0 : index
    %126 = vector.load %arg11[%125, %c0_45, %c0_46] : memref<8x8x128xf32, #tpu.memory_space<vmem>>, vector<1x8x128xf32>
    %127 = vector.shape_cast %126 : vector<1x8x128xf32> to vector<8x128xf32>
    %c0_47 = arith.constant 0 : index
    %c0_48 = arith.constant 0 : index
    %128 = vector.load %arg3[%c0_47, %c0_48] : memref<32x128xf32, #tpu.memory_space<vmem>>, vector<32x128xf32>
    %cst_49 = arith.constant dense<0.000000e+00> : vector<8x128xf32>
    %129 = tpu.matmul %103, %128, %cst_49 {dimension_numbers = #tpu.dot_dimension_numbers<[1], [0], [0], [1], [0, 0, 1, 1], [], []>} : vector<8x32xf32>, vector<32x128xf32>, vector<8x128xf32> -> vector<8x128xf32>
    %130 = arith.addf %127, %129 : vector<8x128xf32>
    %131 = arith.negf %130 : vector<8x128xf32>
    %132 = math.exp %131 : vector<8x128xf32>
    %cst_50 = arith.constant 1.000000e+00 : f32
    %133 = vector.broadcast %cst_50 : f32 to vector<8x128xf32>
    %134 = arith.addf %133, %132 : vector<8x128xf32>
    %135 = arith.divf %133, %134 : vector<8x128xf32>
    %136 = math.tanh %130 : vector<8x128xf32>
    %137 = vector.extract_strided_slice %135 {offsets = [0, 0], sizes = [8, 32], strides = [1, 1]} : vector<8x128xf32> to vector<8x32xf32>
    %138 = vector.extract_strided_slice %135 {offsets = [0, 32], sizes = [8, 32], strides = [1, 1]} : vector<8x128xf32> to vector<8x32xf32>
    %139 = vector.extract_strided_slice %136 {offsets = [0, 64], sizes = [8, 32], strides = [1, 1]} : vector<8x128xf32> to vector<8x32xf32>
    %140 = vector.extract_strided_slice %135 {offsets = [0, 96], sizes = [8, 32], strides = [1, 1]} : vector<8x128xf32> to vector<8x32xf32>
    %141 = arith.mulf %138, %101 : vector<8x32xf32>
    %142 = arith.mulf %137, %139 : vector<8x32xf32>
    %143 = arith.addf %141, %142 : vector<8x32xf32>
    %144 = math.tanh %143 : vector<8x32xf32>
    %145 = arith.mulf %140, %144 : vector<8x32xf32>
    %c0_51 = arith.constant 0 : index
    %c0_52 = arith.constant 0 : index
    %146 = vector.load %arg5[%c0_51, %c0_52] : memref<32x128xf32, #tpu.memory_space<vmem>>, vector<32x128xf32>
    %cst_53 = arith.constant dense<0.000000e+00> : vector<8x128xf32>
    %147 = tpu.matmul %145, %146, %cst_53 {dimension_numbers = #tpu.dot_dimension_numbers<[1], [0], [0], [1], [0, 0, 1, 1], [], []>} : vector<8x32xf32>, vector<32x128xf32>, vector<8x128xf32> -> vector<8x128xf32>
    %c0_54 = arith.constant 0 : index
    %c0_55 = arith.constant 0 : index
    %148 = vector.load %arg6[%c0_54, %c0_55] : memref<32x128xf32, #tpu.memory_space<vmem>>, vector<32x128xf32>
    %cst_56 = arith.constant dense<0.000000e+00> : vector<8x128xf32>
    %149 = tpu.matmul %124, %148, %cst_56 {dimension_numbers = #tpu.dot_dimension_numbers<[1], [0], [0], [1], [0, 0, 1, 1], [], []>} : vector<8x32xf32>, vector<32x128xf32>, vector<8x128xf32> -> vector<8x128xf32>
    %150 = arith.addf %147, %149 : vector<8x128xf32>
    %151 = arith.addf %150, %11 : vector<8x128xf32>
    %152 = arith.negf %151 : vector<8x128xf32>
    %153 = math.exp %152 : vector<8x128xf32>
    %cst_57 = arith.constant 1.000000e+00 : f32
    %154 = vector.broadcast %cst_57 : f32 to vector<8x128xf32>
    %155 = arith.addf %154, %153 : vector<8x128xf32>
    %156 = arith.divf %154, %155 : vector<8x128xf32>
    %157 = math.tanh %151 : vector<8x128xf32>
    %158 = vector.extract_strided_slice %156 {offsets = [0, 0], sizes = [8, 32], strides = [1, 1]} : vector<8x128xf32> to vector<8x32xf32>
    %159 = vector.extract_strided_slice %156 {offsets = [0, 32], sizes = [8, 32], strides = [1, 1]} : vector<8x128xf32> to vector<8x32xf32>
    %160 = vector.extract_strided_slice %157 {offsets = [0, 64], sizes = [8, 32], strides = [1, 1]} : vector<8x128xf32> to vector<8x32xf32>
    %161 = vector.extract_strided_slice %156 {offsets = [0, 96], sizes = [8, 32], strides = [1, 1]} : vector<8x128xf32> to vector<8x32xf32>
    %162 = arith.mulf %159, %122 : vector<8x32xf32>
    %163 = arith.mulf %158, %160 : vector<8x32xf32>
    %164 = arith.addf %162, %163 : vector<8x32xf32>
    %165 = math.tanh %164 : vector<8x32xf32>
    %166 = arith.mulf %161, %165 : vector<8x32xf32>
    %c4_i32 = arith.constant 4 : i32
    %167 = arith.index_cast %c4_i32 : i32 to index
    %c0_58 = arith.constant 0 : index
    %c0_59 = arith.constant 0 : index
    %168 = vector.load %arg11[%167, %c0_58, %c0_59] : memref<8x8x128xf32, #tpu.memory_space<vmem>>, vector<1x8x128xf32>
    %169 = vector.shape_cast %168 : vector<1x8x128xf32> to vector<8x128xf32>
    %c0_60 = arith.constant 0 : index
    %c0_61 = arith.constant 0 : index
    %170 = vector.load %arg3[%c0_60, %c0_61] : memref<32x128xf32, #tpu.memory_space<vmem>>, vector<32x128xf32>
    %cst_62 = arith.constant dense<0.000000e+00> : vector<8x128xf32>
    %171 = tpu.matmul %145, %170, %cst_62 {dimension_numbers = #tpu.dot_dimension_numbers<[1], [0], [0], [1], [0, 0, 1, 1], [], []>} : vector<8x32xf32>, vector<32x128xf32>, vector<8x128xf32> -> vector<8x128xf32>
    %172 = arith.addf %169, %171 : vector<8x128xf32>
    %173 = arith.negf %172 : vector<8x128xf32>
    %174 = math.exp %173 : vector<8x128xf32>
    %cst_63 = arith.constant 1.000000e+00 : f32
    %175 = vector.broadcast %cst_63 : f32 to vector<8x128xf32>
    %176 = arith.addf %175, %174 : vector<8x128xf32>
    %177 = arith.divf %175, %176 : vector<8x128xf32>
    %178 = math.tanh %172 : vector<8x128xf32>
    %179 = vector.extract_strided_slice %177 {offsets = [0, 0], sizes = [8, 32], strides = [1, 1]} : vector<8x128xf32> to vector<8x32xf32>
    %180 = vector.extract_strided_slice %177 {offsets = [0, 32], sizes = [8, 32], strides = [1, 1]} : vector<8x128xf32> to vector<8x32xf32>
    %181 = vector.extract_strided_slice %178 {offsets = [0, 64], sizes = [8, 32], strides = [1, 1]} : vector<8x128xf32> to vector<8x32xf32>
    %182 = vector.extract_strided_slice %177 {offsets = [0, 96], sizes = [8, 32], strides = [1, 1]} : vector<8x128xf32> to vector<8x32xf32>
    %183 = arith.mulf %180, %143 : vector<8x32xf32>
    %184 = arith.mulf %179, %181 : vector<8x32xf32>
    %185 = arith.addf %183, %184 : vector<8x32xf32>
    %186 = math.tanh %185 : vector<8x32xf32>
    %187 = arith.mulf %182, %186 : vector<8x32xf32>
    %c0_64 = arith.constant 0 : index
    %c0_65 = arith.constant 0 : index
    %188 = vector.load %arg5[%c0_64, %c0_65] : memref<32x128xf32, #tpu.memory_space<vmem>>, vector<32x128xf32>
    %cst_66 = arith.constant dense<0.000000e+00> : vector<8x128xf32>
    %189 = tpu.matmul %187, %188, %cst_66 {dimension_numbers = #tpu.dot_dimension_numbers<[1], [0], [0], [1], [0, 0, 1, 1], [], []>} : vector<8x32xf32>, vector<32x128xf32>, vector<8x128xf32> -> vector<8x128xf32>
    %c0_67 = arith.constant 0 : index
    %c0_68 = arith.constant 0 : index
    %190 = vector.load %arg6[%c0_67, %c0_68] : memref<32x128xf32, #tpu.memory_space<vmem>>, vector<32x128xf32>
    %cst_69 = arith.constant dense<0.000000e+00> : vector<8x128xf32>
    %191 = tpu.matmul %166, %190, %cst_69 {dimension_numbers = #tpu.dot_dimension_numbers<[1], [0], [0], [1], [0, 0, 1, 1], [], []>} : vector<8x32xf32>, vector<32x128xf32>, vector<8x128xf32> -> vector<8x128xf32>
    %192 = arith.addf %189, %191 : vector<8x128xf32>
    %193 = arith.addf %192, %11 : vector<8x128xf32>
    %194 = arith.negf %193 : vector<8x128xf32>
    %195 = math.exp %194 : vector<8x128xf32>
    %cst_70 = arith.constant 1.000000e+00 : f32
    %196 = vector.broadcast %cst_70 : f32 to vector<8x128xf32>
    %197 = arith.addf %196, %195 : vector<8x128xf32>
    %198 = arith.divf %196, %197 : vector<8x128xf32>
    %199 = math.tanh %193 : vector<8x128xf32>
    %200 = vector.extract_strided_slice %198 {offsets = [0, 0], sizes = [8, 32], strides = [1, 1]} : vector<8x128xf32> to vector<8x32xf32>
    %201 = vector.extract_strided_slice %198 {offsets = [0, 32], sizes = [8, 32], strides = [1, 1]} : vector<8x128xf32> to vector<8x32xf32>
    %202 = vector.extract_strided_slice %199 {offsets = [0, 64], sizes = [8, 32], strides = [1, 1]} : vector<8x128xf32> to vector<8x32xf32>
    %203 = vector.extract_strided_slice %198 {offsets = [0, 96], sizes = [8, 32], strides = [1, 1]} : vector<8x128xf32> to vector<8x32xf32>
    %204 = arith.mulf %201, %164 : vector<8x32xf32>
    %205 = arith.mulf %200, %202 : vector<8x32xf32>
    %206 = arith.addf %204, %205 : vector<8x32xf32>
    %207 = math.tanh %206 : vector<8x32xf32>
    %208 = arith.mulf %203, %207 : vector<8x32xf32>
    %c5_i32 = arith.constant 5 : i32
    %209 = arith.index_cast %c5_i32 : i32 to index
    %c0_71 = arith.constant 0 : index
    %c0_72 = arith.constant 0 : index
    %210 = vector.load %arg11[%209, %c0_71, %c0_72] : memref<8x8x128xf32, #tpu.memory_space<vmem>>, vector<1x8x128xf32>
    %211 = vector.shape_cast %210 : vector<1x8x128xf32> to vector<8x128xf32>
    %c0_73 = arith.constant 0 : index
    %c0_74 = arith.constant 0 : index
    %212 = vector.load %arg3[%c0_73, %c0_74] : memref<32x128xf32, #tpu.memory_space<vmem>>, vector<32x128xf32>
    %cst_75 = arith.constant dense<0.000000e+00> : vector<8x128xf32>
    %213 = tpu.matmul %187, %212, %cst_75 {dimension_numbers = #tpu.dot_dimension_numbers<[1], [0], [0], [1], [0, 0, 1, 1], [], []>} : vector<8x32xf32>, vector<32x128xf32>, vector<8x128xf32> -> vector<8x128xf32>
    %214 = arith.addf %211, %213 : vector<8x128xf32>
    %215 = arith.negf %214 : vector<8x128xf32>
    %216 = math.exp %215 : vector<8x128xf32>
    %cst_76 = arith.constant 1.000000e+00 : f32
    %217 = vector.broadcast %cst_76 : f32 to vector<8x128xf32>
    %218 = arith.addf %217, %216 : vector<8x128xf32>
    %219 = arith.divf %217, %218 : vector<8x128xf32>
    %220 = math.tanh %214 : vector<8x128xf32>
    %221 = vector.extract_strided_slice %219 {offsets = [0, 0], sizes = [8, 32], strides = [1, 1]} : vector<8x128xf32> to vector<8x32xf32>
    %222 = vector.extract_strided_slice %219 {offsets = [0, 32], sizes = [8, 32], strides = [1, 1]} : vector<8x128xf32> to vector<8x32xf32>
    %223 = vector.extract_strided_slice %220 {offsets = [0, 64], sizes = [8, 32], strides = [1, 1]} : vector<8x128xf32> to vector<8x32xf32>
    %224 = vector.extract_strided_slice %219 {offsets = [0, 96], sizes = [8, 32], strides = [1, 1]} : vector<8x128xf32> to vector<8x32xf32>
    %225 = arith.mulf %222, %185 : vector<8x32xf32>
    %226 = arith.mulf %221, %223 : vector<8x32xf32>
    %227 = arith.addf %225, %226 : vector<8x32xf32>
    %228 = math.tanh %227 : vector<8x32xf32>
    %229 = arith.mulf %224, %228 : vector<8x32xf32>
    %c0_77 = arith.constant 0 : index
    %c0_78 = arith.constant 0 : index
    %230 = vector.load %arg5[%c0_77, %c0_78] : memref<32x128xf32, #tpu.memory_space<vmem>>, vector<32x128xf32>
    %cst_79 = arith.constant dense<0.000000e+00> : vector<8x128xf32>
    %231 = tpu.matmul %229, %230, %cst_79 {dimension_numbers = #tpu.dot_dimension_numbers<[1], [0], [0], [1], [0, 0, 1, 1], [], []>} : vector<8x32xf32>, vector<32x128xf32>, vector<8x128xf32> -> vector<8x128xf32>
    %c0_80 = arith.constant 0 : index
    %c0_81 = arith.constant 0 : index
    %232 = vector.load %arg6[%c0_80, %c0_81] : memref<32x128xf32, #tpu.memory_space<vmem>>, vector<32x128xf32>
    %cst_82 = arith.constant dense<0.000000e+00> : vector<8x128xf32>
    %233 = tpu.matmul %208, %232, %cst_82 {dimension_numbers = #tpu.dot_dimension_numbers<[1], [0], [0], [1], [0, 0, 1, 1], [], []>} : vector<8x32xf32>, vector<32x128xf32>, vector<8x128xf32> -> vector<8x128xf32>
    %234 = arith.addf %231, %233 : vector<8x128xf32>
    %235 = arith.addf %234, %11 : vector<8x128xf32>
    %236 = arith.negf %235 : vector<8x128xf32>
    %237 = math.exp %236 : vector<8x128xf32>
    %cst_83 = arith.constant 1.000000e+00 : f32
    %238 = vector.broadcast %cst_83 : f32 to vector<8x128xf32>
    %239 = arith.addf %238, %237 : vector<8x128xf32>
    %240 = arith.divf %238, %239 : vector<8x128xf32>
    %241 = math.tanh %235 : vector<8x128xf32>
    %242 = vector.extract_strided_slice %240 {offsets = [0, 0], sizes = [8, 32], strides = [1, 1]} : vector<8x128xf32> to vector<8x32xf32>
    %243 = vector.extract_strided_slice %240 {offsets = [0, 32], sizes = [8, 32], strides = [1, 1]} : vector<8x128xf32> to vector<8x32xf32>
    %244 = vector.extract_strided_slice %241 {offsets = [0, 64], sizes = [8, 32], strides = [1, 1]} : vector<8x128xf32> to vector<8x32xf32>
    %245 = vector.extract_strided_slice %240 {offsets = [0, 96], sizes = [8, 32], strides = [1, 1]} : vector<8x128xf32> to vector<8x32xf32>
    %246 = arith.mulf %243, %206 : vector<8x32xf32>
    %247 = arith.mulf %242, %244 : vector<8x32xf32>
    %248 = arith.addf %246, %247 : vector<8x32xf32>
    %249 = math.tanh %248 : vector<8x32xf32>
    %250 = arith.mulf %245, %249 : vector<8x32xf32>
    %c6_i32 = arith.constant 6 : i32
    %251 = arith.index_cast %c6_i32 : i32 to index
    %c0_84 = arith.constant 0 : index
    %c0_85 = arith.constant 0 : index
    %252 = vector.load %arg11[%251, %c0_84, %c0_85] : memref<8x8x128xf32, #tpu.memory_space<vmem>>, vector<1x8x128xf32>
    %253 = vector.shape_cast %252 : vector<1x8x128xf32> to vector<8x128xf32>
    %c0_86 = arith.constant 0 : index
    %c0_87 = arith.constant 0 : index
    %254 = vector.load %arg3[%c0_86, %c0_87] : memref<32x128xf32, #tpu.memory_space<vmem>>, vector<32x128xf32>
    %cst_88 = arith.constant dense<0.000000e+00> : vector<8x128xf32>
    %255 = tpu.matmul %229, %254, %cst_88 {dimension_numbers = #tpu.dot_dimension_numbers<[1], [0], [0], [1], [0, 0, 1, 1], [], []>} : vector<8x32xf32>, vector<32x128xf32>, vector<8x128xf32> -> vector<8x128xf32>
    %256 = arith.addf %253, %255 : vector<8x128xf32>
    %257 = arith.negf %256 : vector<8x128xf32>
    %258 = math.exp %257 : vector<8x128xf32>
    %cst_89 = arith.constant 1.000000e+00 : f32
    %259 = vector.broadcast %cst_89 : f32 to vector<8x128xf32>
    %260 = arith.addf %259, %258 : vector<8x128xf32>
    %261 = arith.divf %259, %260 : vector<8x128xf32>
    %262 = math.tanh %256 : vector<8x128xf32>
    %263 = vector.extract_strided_slice %261 {offsets = [0, 0], sizes = [8, 32], strides = [1, 1]} : vector<8x128xf32> to vector<8x32xf32>
    %264 = vector.extract_strided_slice %261 {offsets = [0, 32], sizes = [8, 32], strides = [1, 1]} : vector<8x128xf32> to vector<8x32xf32>
    %265 = vector.extract_strided_slice %262 {offsets = [0, 64], sizes = [8, 32], strides = [1, 1]} : vector<8x128xf32> to vector<8x32xf32>
    %266 = vector.extract_strided_slice %261 {offsets = [0, 96], sizes = [8, 32], strides = [1, 1]} : vector<8x128xf32> to vector<8x32xf32>
    %267 = arith.mulf %264, %227 : vector<8x32xf32>
    %268 = arith.mulf %263, %265 : vector<8x32xf32>
    %269 = arith.addf %267, %268 : vector<8x32xf32>
    %270 = math.tanh %269 : vector<8x32xf32>
    %271 = arith.mulf %266, %270 : vector<8x32xf32>
    %c0_90 = arith.constant 0 : index
    %c0_91 = arith.constant 0 : index
    %272 = vector.load %arg5[%c0_90, %c0_91] : memref<32x128xf32, #tpu.memory_space<vmem>>, vector<32x128xf32>
    %cst_92 = arith.constant dense<0.000000e+00> : vector<8x128xf32>
    %273 = tpu.matmul %271, %272, %cst_92 {dimension_numbers = #tpu.dot_dimension_numbers<[1], [0], [0], [1], [0, 0, 1, 1], [], []>} : vector<8x32xf32>, vector<32x128xf32>, vector<8x128xf32> -> vector<8x128xf32>
    %c0_93 = arith.constant 0 : index
    %c0_94 = arith.constant 0 : index
    %274 = vector.load %arg6[%c0_93, %c0_94] : memref<32x128xf32, #tpu.memory_space<vmem>>, vector<32x128xf32>
    %cst_95 = arith.constant dense<0.000000e+00> : vector<8x128xf32>
    %275 = tpu.matmul %250, %274, %cst_95 {dimension_numbers = #tpu.dot_dimension_numbers<[1], [0], [0], [1], [0, 0, 1, 1], [], []>} : vector<8x32xf32>, vector<32x128xf32>, vector<8x128xf32> -> vector<8x128xf32>
    %276 = arith.addf %273, %275 : vector<8x128xf32>
    %277 = arith.addf %276, %11 : vector<8x128xf32>
    %278 = arith.negf %277 : vector<8x128xf32>
    %279 = math.exp %278 : vector<8x128xf32>
    %cst_96 = arith.constant 1.000000e+00 : f32
    %280 = vector.broadcast %cst_96 : f32 to vector<8x128xf32>
    %281 = arith.addf %280, %279 : vector<8x128xf32>
    %282 = arith.divf %280, %281 : vector<8x128xf32>
    %283 = math.tanh %277 : vector<8x128xf32>
    %284 = vector.extract_strided_slice %282 {offsets = [0, 0], sizes = [8, 32], strides = [1, 1]} : vector<8x128xf32> to vector<8x32xf32>
    %285 = vector.extract_strided_slice %282 {offsets = [0, 32], sizes = [8, 32], strides = [1, 1]} : vector<8x128xf32> to vector<8x32xf32>
    %286 = vector.extract_strided_slice %283 {offsets = [0, 64], sizes = [8, 32], strides = [1, 1]} : vector<8x128xf32> to vector<8x32xf32>
    %287 = vector.extract_strided_slice %282 {offsets = [0, 96], sizes = [8, 32], strides = [1, 1]} : vector<8x128xf32> to vector<8x32xf32>
    %288 = arith.mulf %285, %248 : vector<8x32xf32>
    %289 = arith.mulf %284, %286 : vector<8x32xf32>
    %290 = arith.addf %288, %289 : vector<8x32xf32>
    %291 = math.tanh %290 : vector<8x32xf32>
    %292 = arith.mulf %287, %291 : vector<8x32xf32>
    %c7_i32 = arith.constant 7 : i32
    %293 = arith.index_cast %c7_i32 : i32 to index
    %c0_97 = arith.constant 0 : index
    %c0_98 = arith.constant 0 : index
    %294 = vector.load %arg11[%293, %c0_97, %c0_98] : memref<8x8x128xf32, #tpu.memory_space<vmem>>, vector<1x8x128xf32>
    %295 = vector.shape_cast %294 : vector<1x8x128xf32> to vector<8x128xf32>
    %c0_99 = arith.constant 0 : index
    %c0_100 = arith.constant 0 : index
    %296 = vector.load %arg3[%c0_99, %c0_100] : memref<32x128xf32, #tpu.memory_space<vmem>>, vector<32x128xf32>
    %cst_101 = arith.constant dense<0.000000e+00> : vector<8x128xf32>
    %297 = tpu.matmul %271, %296, %cst_101 {dimension_numbers = #tpu.dot_dimension_numbers<[1], [0], [0], [1], [0, 0, 1, 1], [], []>} : vector<8x32xf32>, vector<32x128xf32>, vector<8x128xf32> -> vector<8x128xf32>
    %298 = arith.addf %295, %297 : vector<8x128xf32>
    %299 = arith.negf %298 : vector<8x128xf32>
    %300 = math.exp %299 : vector<8x128xf32>
    %cst_102 = arith.constant 1.000000e+00 : f32
    %301 = vector.broadcast %cst_102 : f32 to vector<8x128xf32>
    %302 = arith.addf %301, %300 : vector<8x128xf32>
    %303 = arith.divf %301, %302 : vector<8x128xf32>
    %304 = math.tanh %298 : vector<8x128xf32>
    %305 = vector.extract_strided_slice %303 {offsets = [0, 0], sizes = [8, 32], strides = [1, 1]} : vector<8x128xf32> to vector<8x32xf32>
    %306 = vector.extract_strided_slice %303 {offsets = [0, 32], sizes = [8, 32], strides = [1, 1]} : vector<8x128xf32> to vector<8x32xf32>
    %307 = vector.extract_strided_slice %304 {offsets = [0, 64], sizes = [8, 32], strides = [1, 1]} : vector<8x128xf32> to vector<8x32xf32>
    %308 = vector.extract_strided_slice %303 {offsets = [0, 96], sizes = [8, 32], strides = [1, 1]} : vector<8x128xf32> to vector<8x32xf32>
    %309 = arith.mulf %306, %269 : vector<8x32xf32>
    %310 = arith.mulf %305, %307 : vector<8x32xf32>
    %311 = arith.addf %309, %310 : vector<8x32xf32>
    %312 = math.tanh %311 : vector<8x32xf32>
    %313 = arith.mulf %308, %312 : vector<8x32xf32>
    %c0_103 = arith.constant 0 : index
    %c0_104 = arith.constant 0 : index
    %314 = vector.load %arg5[%c0_103, %c0_104] : memref<32x128xf32, #tpu.memory_space<vmem>>, vector<32x128xf32>
    %cst_105 = arith.constant dense<0.000000e+00> : vector<8x128xf32>
    %315 = tpu.matmul %313, %314, %cst_105 {dimension_numbers = #tpu.dot_dimension_numbers<[1], [0], [0], [1], [0, 0, 1, 1], [], []>} : vector<8x32xf32>, vector<32x128xf32>, vector<8x128xf32> -> vector<8x128xf32>
    %c0_106 = arith.constant 0 : index
    %c0_107 = arith.constant 0 : index
    %316 = vector.load %arg6[%c0_106, %c0_107] : memref<32x128xf32, #tpu.memory_space<vmem>>, vector<32x128xf32>
    %cst_108 = arith.constant dense<0.000000e+00> : vector<8x128xf32>
    %317 = tpu.matmul %292, %316, %cst_108 {dimension_numbers = #tpu.dot_dimension_numbers<[1], [0], [0], [1], [0, 0, 1, 1], [], []>} : vector<8x32xf32>, vector<32x128xf32>, vector<8x128xf32> -> vector<8x128xf32>
    %318 = arith.addf %315, %317 : vector<8x128xf32>
    %319 = arith.addf %318, %11 : vector<8x128xf32>
    %320 = arith.negf %319 : vector<8x128xf32>
    %321 = math.exp %320 : vector<8x128xf32>
    %cst_109 = arith.constant 1.000000e+00 : f32
    %322 = vector.broadcast %cst_109 : f32 to vector<8x128xf32>
    %323 = arith.addf %322, %321 : vector<8x128xf32>
    %324 = arith.divf %322, %323 : vector<8x128xf32>
    %325 = math.tanh %319 : vector<8x128xf32>
    %326 = vector.extract_strided_slice %324 {offsets = [0, 0], sizes = [8, 32], strides = [1, 1]} : vector<8x128xf32> to vector<8x32xf32>
    %327 = vector.extract_strided_slice %324 {offsets = [0, 32], sizes = [8, 32], strides = [1, 1]} : vector<8x128xf32> to vector<8x32xf32>
    %328 = vector.extract_strided_slice %325 {offsets = [0, 64], sizes = [8, 32], strides = [1, 1]} : vector<8x128xf32> to vector<8x32xf32>
    %329 = vector.extract_strided_slice %324 {offsets = [0, 96], sizes = [8, 32], strides = [1, 1]} : vector<8x128xf32> to vector<8x32xf32>
    %330 = arith.mulf %327, %290 : vector<8x32xf32>
    %331 = arith.mulf %326, %328 : vector<8x32xf32>
    %332 = arith.addf %330, %331 : vector<8x32xf32>
    %333 = math.tanh %332 : vector<8x32xf32>
    %334 = arith.mulf %329, %333 : vector<8x32xf32>
    %c7_i32_110 = arith.constant 7 : i32
    %c0_111 = arith.constant 0 : index
    %c0_112 = arith.constant 0 : index
    %335 = vector.load %arg8[%c0_111, %c0_112] : memref<32x128xf32, #tpu.memory_space<vmem>>, vector<32x128xf32>
    %cst_113 = arith.constant dense<0.000000e+00> : vector<8x128xf32>
    %336 = tpu.matmul %334, %335, %cst_113 {dimension_numbers = #tpu.dot_dimension_numbers<[1], [0], [0], [1], [0, 0, 1, 1], [], []>} : vector<8x32xf32>, vector<32x128xf32>, vector<8x128xf32> -> vector<8x128xf32>
    %c0_114 = arith.constant 0 : index
    %c0_115 = arith.constant 0 : index
    %337 = vector.load %arg9[%c0_114, %c0_115] : memref<1x128xf32, #tpu.memory_space<vmem>>, vector<1x128xf32>
    %338 = vector.broadcast %337 : vector<1x128xf32> to vector<8x128xf32>
    %339 = arith.addf %336, %338 : vector<8x128xf32>
    %c0_116 = arith.constant 0 : index
    %c0_117 = arith.constant 0 : index
    %340 = vector.load %arg10[%c0_116, %c0_117] : memref<8x128xf32, #tpu.memory_space<vmem>>, vector<8x128xf32>
    tpu.vector_store %arg10[%c0_116, %c0_117], %339 {strides = array<i32>} : memref<8x128xf32, #tpu.memory_space<vmem>>, vector<8x128xf32>,
    return
  }
  func.func @transform_0(%arg0: i32) -> (i32, i32, i32) {
    %c0_i32 = arith.constant 0 : i32
    %c0_i32_0 = arith.constant 0 : i32
    %c0_i32_1 = arith.constant 0 : i32
    return %c0_i32, %arg0, %c0_i32_0 : i32, i32, i32
  }
  func.func @transform_1(%arg0: i32) -> (i32, i32) {
    %c0_i32 = arith.constant 0 : i32
    %c0_i32_0 = arith.constant 0 : i32
    %c0_i32_1 = arith.constant 0 : i32
    return %c0_i32, %c0_i32_0 : i32, i32
  }
  func.func @transform_2(%arg0: i32) -> (i32, i32) {
    %c0_i32 = arith.constant 0 : i32
    %c0_i32_0 = arith.constant 0 : i32
    %c0_i32_1 = arith.constant 0 : i32
    return %c0_i32, %c0_i32_0 : i32, i32
  }
  func.func @transform_3(%arg0: i32) -> (i32, i32) {
    %c0_i32 = arith.constant 0 : i32
    %c0_i32_0 = arith.constant 0 : i32
    %c0_i32_1 = arith.constant 0 : i32
    return %c0_i32, %c0_i32_0 : i32, i32
  }
  func.func @transform_4(%arg0: i32) -> (i32, i32) {
    %c0_i32 = arith.constant 0 : i32
    %c0_i32_0 = arith.constant 0 : i32
    %c0_i32_1 = arith.constant 0 : i32
    return %c0_i32, %c0_i32_0 : i32, i32
  }
  func.func @transform_5(%arg0: i32) -> (i32, i32) {
    %c0_i32 = arith.constant 0 : i32
    %c0_i32_0 = arith.constant 0 : i32
    %c0_i32_1 = arith.constant 0 : i32
    return %c0_i32, %c0_i32_0 : i32, i32
  }
  func.func @transform_6(%arg0: i32) -> (i32, i32) {
    %c0_i32 = arith.constant 0 : i32
    %c0_i32_0 = arith.constant 0 : i32
    %c0_i32_1 = arith.constant 0 : i32
    return %c0_i32, %c0_i32_0 : i32, i32
  }
  func.func @transform_7(%arg0: i32) -> (i32, i32) {
    %c0_i32 = arith.constant 0 : i32
    %c0_i32_0 = arith.constant 0 : i32
    %c0_i32_1 = arith.constant 0 : i32
    return %c0_i32, %c0_i32_0 : i32, i32
  }
  func.func @transform_8(%arg0: i32) -> (i32, i32) {
    %c0_i32 = arith.constant 0 : i32
    %c0_i32_0 = arith.constant 0 : i32
    %c0_i32_1 = arith.constant 0 : i32
    return %c0_i32, %c0_i32_0 : i32, i32
  }
  func.func @transform_9(%arg0: i32) -> (i32, i32) {
    %c0_i32 = arith.constant 0 : i32
    %c0_i32_0 = arith.constant 0 : i32
    return %arg0, %c0_i32 : i32, i32
  }
}

</mosaic_0001>

<bundles_post_ra>
// kernel: tpu_custom_call.1
= control target key start
LH: loop header
LB: loop body
LE: loop exit
PB: predicated region body
PF: predicated region fallthrough
CT: control target
= control target key end

     0   :  { %14 = vsyncpa [#allocation4], 0  ;;  %s3841_s0 = inlined_call_operand.hbm [shape: f32[8,8,16], index: 0, kind: input, shape index: {}]   ;;  %s3842_s1 = inlined_call_operand.hbm [shape: f32[16,128], index: 1, kind: input, shape index: {}]   ;;  %s3843_s2 = inlined_call_operand.hbm [shape: f32[32,128], index: 2, kind: input, shape index: {}]   ;;  %s3844_s3 = inlined_call_operand.vmem [shape: f32[1,128], index: 3, kind: input, shape index: {}]   ;;  %s3845_s4 = inlined_call_operand.hbm [shape: f32[32,128], index: 4, kind: input, shape index: {}]   ;;  %s3846_s5 = inlined_call_operand.hbm [shape: f32[32,128], index: 5, kind: input, shape index: {}]   ;;  %s3847_s6 = inlined_call_operand.vmem [shape: f32[1,128], index: 6, kind: input, shape index: {}]   ;;  %s3848_s7 = inlined_call_operand.hbm [shape: f32[32,128], index: 7, kind: input, shape index: {}]   ;;  %s3849_s8 = inlined_call_operand.vmem [shape: f32[1,128], index: 8, kind: input, shape index: {}]   ;;  %s3850_s9 = inlined_call_operand.hbm [shape: f32[8,128], index: 9, kind: output, shape index: {}]  }
   0x1   :  { %15 = vsyncpa [#allocation7], 0 }
   0x2   :  { %16 = vsyncpa [#allocation10], 0 }
   0x3   :  { %17 = vsyncpa [#allocation13], 0 }
   0x4   :  { %18 = vsyncpa [#allocation5], 0  ;;  %s3314_s30 = smov [#allocation6]   ;;  %s3315_s11 = smov [#allocation9]  }
   0x5   :  { %s36_s10 = sshll.u32 %s3314_s30, 4  ;;  %s62_s12 = sshll.u32 %s3315_s11, 4  ;;  %s37_s10 = int_to_ptr.vmem [resolvable:$true] %s36_s10  ;;  %s3379_s12 = int_to_ptr.vmem [resolvable:$true] %s62_s12 }
   0x6   :  { %s3150_s15 = scalar_lea.hbm %s3842_s1, 256 }
   0x7   :  { %p3151_p0 = scmp.ne.s32.totalorder %s3842_s1, %s3150_s15  ;;  %p3154_p1 = scmp.lt.u32.totalorder %s3150_s15, %s3842_s1 }
   0x9   :  { %p3156_p2 = pnand %p3154_p1, %p3151_p0 }
   0xb   :  { %3159 = shalt.err (!%p3156_p2)
}
   0xc   :  { %s3160_s20 = scalar_lea.vmem %s37_s10, 256  ;;  %p3165_p4 = scmp.lt.s32.totalorder %s37_s10, %s37_s10 }
   0xd   :  { %p3161_p3 = scmp.ne.s32.totalorder %s37_s10, %s3160_s20  ;;  %p3166_p5 = scmp.lt.s32.totalorder %s3160_s20, %s3160_s20 }
   0xf   :  { %p3167_p6 = por %p3166_p5, %p3165_p4 }
  0x11   :  { %p3168_p7 = pnand %p3167_p6, %p3161_p3 }
  0x13   :  { %3171 = shalt.err (!%p3168_p7)
}
  0x14   :  { %s3316_s21 = smov 128   ;;  %s3317_s22 = smov 8  }
  0x15   :  { %42 = dma.hbm_to_vmem [thread:$0]  %s3842_s1, 256, %s37_s10, [#allocation7], %s3316_s21, %s3316_s21, %s3317_s22  }
  0x16   :  { %s3172_s27 = scalar_lea.hbm %s3845_s4, 512 }
  0x17   :  { %p3173_p8 = scmp.ne.s32.totalorder %s3845_s4, %s3172_s27  ;;  %p3176_p9 = scmp.lt.u32.totalorder %s3172_s27, %s3845_s4 }
  0x19   :  { %p3178_p10 = pnand %p3176_p9, %p3173_p8 }
  0x1b   :  { %3181 = shalt.err (!%p3178_p10)
}
  0x1c   :  { %s3182_s13 = scalar_lea.vmem %s3379_s12, 512  ;;  %p3187_p12 = scmp.lt.s32.totalorder %s3379_s12, %s3379_s12 }
  0x1d   :  { %p3183_p11 = scmp.ne.s32.totalorder %s3379_s12, %s3182_s13  ;;  %p3188_p13 = scmp.lt.s32.totalorder %s3182_s13, %s3182_s13 }
  0x1f   :  { %p3189_p0 = por %p3188_p13, %p3187_p12 }
  0x21   :  { %p3190_p1 = pnand %p3189_p0, %p3183_p11 }
  0x23   :  { %3193 = shalt.err (!%p3190_p1)
}
  0x24   :  { %68 = dma.hbm_to_vmem [thread:$0]  %s3845_s4, 512, %s3379_s12, [#allocation10], %s3316_s21, %s3316_s21, %s3317_s22  }
  0x25   :  { %s3318_s14 = smov [#allocation3]   ;;  %s3319_s16 = smov [#allocation8]  }
  0x26   :  { %s24_s15 = sshll.u32 %s3318_s14, 4  ;;  %s48_s17 = sshll.u32 %s3319_s16, 4  ;;  %s25_s15 = int_to_ptr.vmem [resolvable:$true] %s24_s15  ;;  %s3416_s17 = int_to_ptr.vmem [resolvable:$true] %s48_s17 }
  0x27   :  { %s3194_s20 = scalar_lea.hbm %s3841_s0, 1024 }
  0x28   :  { %p3195_p2 = scmp.ne.s32.totalorder %s3841_s0, %s3194_s20  ;;  %p3198_p3 = scmp.lt.u32.totalorder %s3194_s20, %s3841_s0 }
  0x2a   :  { %p3200_p4 = pnand %p3198_p3, %p3195_p2 }
  0x2c   :  { %3203 = shalt.err (!%p3200_p4)
}
  0x2d   :  { %s3204_s4 = scalar_lea.vmem %s25_s15, 1024  ;;  %p3209_p6 = scmp.lt.s32.totalorder %s25_s15, %s25_s15 }
  0x2e   :  { %p3205_p5 = scmp.ne.s32.totalorder %s25_s15, %s3204_s4  ;;  %p3210_p7 = scmp.lt.s32.totalorder %s3204_s4, %s3204_s4 }
  0x30   :  { %p3211_p8 = por %p3210_p7, %p3209_p6 }
  0x32   :  { %p3212_p9 = pnand %p3211_p8, %p3205_p5 }
  0x34   :  { %3215 = shalt.err (!%p3212_p9)
}
  0x35   :  { %30 = dma.hbm_to_vmem [thread:$0]  %s3841_s0, 1024, %s25_s15, [#allocation4], %s3316_s21, %s3316_s21, %s3317_s22  }
  0x36   :  { %s3216_s30 = scalar_lea.hbm %s3843_s2, 512 }
  0x37   :  { %p3217_p10 = scmp.ne.s32.totalorder %s3843_s2, %s3216_s30  ;;  %p3220_p11 = scmp.lt.u32.totalorder %s3216_s30, %s3843_s2 }
  0x39   :  { %p3222_p12 = pnand %p3220_p11, %p3217_p10 }
  0x3b   :  { %3225 = shalt.err (!%p3222_p12)
}
  0x3c   :  { %s3226_s14 = scalar_lea.vmem %s3416_s17, 512  ;;  %p3231_p0 = scmp.lt.s32.totalorder %s3416_s17, %s3416_s17 }
  0x3d   :  { %p3227_p13 = scmp.ne.s32.totalorder %s3416_s17, %s3226_s14  ;;  %p3232_p1 = scmp.lt.s32.totalorder %s3226_s14, %s3226_s14 }
  0x3f   :  { %p3233_p2 = por %p3232_p1, %p3231_p0 }
  0x41   :  { %p3234_p3 = pnand %p3233_p2, %p3227_p13 }
  0x43   :  { %3237 = shalt.err (!%p3234_p3)
}
  0x44   :  { %54 = dma.hbm_to_vmem [thread:$0]  %s3843_s2, 512, %s3416_s17, [#allocation7], %s3316_s21, %s3316_s21, %s3317_s22  }
  0x45   :  { %s3320_s16 = smov [#allocation11]   ;;  %s3321_s19 = smov [#allocation12]  }
  0x46   :  { %s74_s18 = sshll.u32 %s3320_s16, 4  ;;  %s88_s20 = sshll.u32 %s3321_s19, 4  ;;  %s75_s18 = int_to_ptr.vmem [resolvable:$true] %s74_s18  ;;  %s3453_s20 = int_to_ptr.vmem [resolvable:$true] %s88_s20 }
  0x47   :  { %s3238_s25 = scalar_lea.hbm %s3846_s5, 512 }
  0x48   :  { %p3239_p4 = scmp.ne.s32.totalorder %s3846_s5, %s3238_s25  ;;  %p3242_p5 = scmp.lt.u32.totalorder %s3238_s25, %s3846_s5 }
  0x4a   :  { %p3244_p6 = pnand %p3242_p5, %p3239_p4 }
  0x4c   :  { %3247 = shalt.err (!%p3244_p6)
}
  0x4d   :  { %s3248_s2 = scalar_lea.vmem %s75_s18, 512  ;;  %p3253_p8 = scmp.lt.s32.totalorder %s75_s18, %s75_s18 }
  0x4e   :  { %p3249_p7 = scmp.ne.s32.totalorder %s75_s18, %s3248_s2  ;;  %p3254_p9 = scmp.lt.s32.totalorder %s3248_s2, %s3248_s2 }
  0x50   :  { %p3255_p10 = por %p3254_p9, %p3253_p8 }
  0x52   :  { %p3256_p11 = pnand %p3255_p10, %p3249_p7 }
  0x54   :  { %3259 = shalt.err (!%p3256_p11)
}
  0x55   :  { %80 = dma.hbm_to_vmem [thread:$0]  %s3846_s5, 512, %s75_s18, [#allocation10], %s3316_s21, %s3316_s21, %s3317_s22  }
  0x56   :  { %s3260_s11 = scalar_lea.hbm %s3848_s7, 512 }
  0x57   :  { %p3261_p12 = scmp.ne.s32.totalorder %s3848_s7, %s3260_s11  ;;  %p3264_p13 = scmp.lt.u32.totalorder %s3260_s11, %s3848_s7 }
  0x59   :  { %p3266_p0 = pnand %p3264_p13, %p3261_p12 }
  0x5b   :  { %3269 = shalt.err (!%p3266_p0)
}
  0x5c   :  { %s3270_s0 = scalar_lea.vmem %s3453_s20, 512  ;;  %p3275_p2 = scmp.lt.s32.totalorder %s3453_s20, %s3453_s20 }
  0x5d   :  { %p3271_p1 = scmp.ne.s32.totalorder %s3453_s20, %s3270_s0  ;;  %p3276_p3 = scmp.lt.s32.totalorder %s3270_s0, %s3270_s0 }
  0x5f   :  { %p3277_p4 = por %p3276_p3, %p3275_p2 }
  0x61   :  { %p3278_p5 = pnand %p3277_p4, %p3271_p1 }
  0x63   :  { %3281 = shalt.err (!%p3278_p5)
}
  0x64   :  { %94 = dma.hbm_to_vmem [thread:$0]  %s3848_s7, 512, %s3453_s20, [#allocation13], %s3316_s21, %s3316_s21, %s3317_s22  }
  0x65   :  { %3304 = dma.done.wait [#allocation4], 1024  }
  0x66   :  { %3305 = vsyncadd [#allocation4], 4294966272 }
  0x67   :  { %3306 = dma.done.wait [#allocation7], 768  }
  0x68   :  { %3307 = vsyncadd [#allocation7], 4294966528 }
  0x69   :  { %3308 = dma.done.wait [#allocation10], 1024  }
  0x6a   :  { %3309 = vsyncadd [#allocation10], 4294966272 }
  0x6b   :  { %3310 = dma.done.wait [#allocation13], 512  }
  0x6c   :  { %3311 = vsyncadd [#allocation13], 4294966784  ;;  %vm132_vm0 = vcmask 130048   ;;  %v123_v0 = vld [vmem:[#allocation6] sm:$0xff]  ;;  %v124_v1 = vld [vmem:[#allocation6 + $0x8] sm:$0xff]  ;;  %s3322_s22 = smov 64  }
  0x6d   :  { %v115_v2 = vld [vmem:[#allocation3] sm:$0xff]  ;;  %v2863_v3 = vpack.c.bf16 %v124_v1, %v123_v0  ;;  %v116_v4 = vld [vmem:[#allocation3 + $0x8] sm:$0xff]  ;;  %v296_v16 = vld [vmem:[#allocation9] sm:$0xff]  ;;  %v3323_v19 = vmov 0.0|0.0   ;;  %vm3324_vm1 = vmmov 0   ;;  %v3325_v22 = vmov 0.0  }
  0x6e   :  { %2598 = vmatprep.mubr.msk.f32.mxu0 %vm132_vm0, %v115_v2  ;;  %v3495_v5 = vld [vmem:[%s3844_s3] ss:$0 sm:$0xff]  ;;  %v297_v17 = vld [vmem:[#allocation9 + $0x8] sm:$0xff]  ;;  %2867 = vmatprep.subr.bf16.mxu1 %v3323_v19  ;;  %v299_v21 = vld [vmem:[#allocation9 + $0x18] sm:$0xff]  ;;  %s3326_s16 = smov 96   ;;  %s3327_s18 = smov 32  }
  0x6f   :  { %2864 = vmatprep.subr.bf16.mxu0 %v2863_v3  ;;  %v298_v18 = vld [vmem:[#allocation9 + $0x10] sm:$0xff]  ;;  %v3500_v20 = vpack.c.bf16 %v297_v17, %v296_v16  ;;  %2618 = vmatprep.mubr.msk.f32.mxu1 %vm3324_vm1, %v3325_v22  ;;  %v396_v27 = vld [vmem:[#allocation8] sm:$0xff]  ;;  %v397_v28 = vld [vmem:[#allocation8 + $0x8] sm:$0xff]  ;;  %vm303_vm2 = vcmask 261120   ;;  %s3328_s4 = smov [#allocation14]  }
  0x70   :  { %2866 = vmatpush3.bf16.msra.mxu0 %v2863_v3  ;;  %v3506_v23 = vpack.c.bf16 %v299_v21, %v298_v18  ;;  %v3514_v29 = vpack.c.bf16 %v397_v28, %v396_v27  ;;  %v398_v30 = vld [vmem:[#allocation8 + $0x10] sm:$0xff]  ;;  %v399_v31 = vld [vmem:[#allocation8 + $0x18] sm:$0xff]  ;;  %v117_v56 = vld [vmem:[#allocation3 + $0x10] sm:$0xff]  ;;  %s2407_s12 = sshll.u32 %s3328_s4, 4  ;;  %s2408_s12 = int_to_ptr.vmem [resolvable:$true] %s2407_s12 }
  0x71   :  { %2879 = vmatprep.subr.bf16.mxu0 %v3323_v19  ;;  %2869 = vmatpush3.bf16.msra.mxu1 %v3500_v20  ;;  %v3518_v33 = vpack.c.bf16 %v399_v31, %v398_v30  ;;  %v3536_v37 = vld [vmem:[%s3847_s6] ss:$0 sm:$0xff]  ;;  %v118_v57 = vld [vmem:[#allocation3 + $0x18] sm:$0xff]  ;;  %v499_v59 = vld [vmem:[#allocation11] sm:$0xff]  ;;  %s3282_s27 = scalar_lea.vmem %s2408_s12, 128  ;;  %p3287_p7 = scmp.lt.s32.totalorder %s2408_s12, %s2408_s12 }
  0x72   :  { %2870 = vmatprep.subr.bf16.mxu1 %v3323_v19  ;;  %v119_v58 = vld [vmem:[#allocation3 + $0x20] sm:$0xff]  ;;  %v500_v60 = vld [vmem:[#allocation11 + $0x8] sm:$0xff]  ;;  %v120_v62 = vld [vmem:[#allocation3 + $0x28] sm:$0xff]  ;;  %p3283_p6 = scmp.ne.s32.totalorder %s2408_s12, %s3282_s27  ;;  %p3288_p8 = scmp.lt.s32.totalorder %s3282_s27, %s3282_s27 }
  0x73   :  { %2599 = vmatmul.mubr.msk.f32.vlgmr.msra.gmra.mrb[0].mxu0 %vm132_vm0, %v116_v4  ;;  %v3547_v61 = vpack.c.bf16 %v500_v60, %v499_v59  ;;  %v121_v63 = vld [vmem:[#allocation3 + $0x30] sm:$0xff]  ;;  %v501_v3 = vld [vmem:[#allocation11 + $0x10] sm:$0xff]  ;;  %v502_v4 = vld [vmem:[#allocation11 + $0x18] sm:$0xff] }
  0x74   :  { %2601 = vmatprep.mubr.msk.f32.mxu0 %vm132_vm0, %v117_v56  ;;  %p3289_p9 = por %p3288_p8, %p3287_p7 }
  0x75   :  { %2872 = vmatpush3.bf16.msra.mxu1 %v3506_v23  ;;  %2881 = vmatpush3.bf16.msra.mxu0 %v3547_v61 }
  0x76   :  { %2873 = vmatprep.subr.bf16.mxu1 %v3323_v19  ;;  %2882 = vmatprep.subr.bf16.mxu0 %v3323_v19  ;;  %p3290_p10 = pnand %p3289_p9, %p3283_p6 }
  0x77   :  { %2602 = vmatmul.mubr.msk.f32.gmra.mrb[2].mxu0 %vm132_vm0, %v118_v57 }
  0x78   :  { %2604 = vmatprep.mubr.msk.f32.mxu0 %vm132_vm0, %v119_v58 }
  0x7b   :  { %2605 = vmatmul.mubr.msk.f32.gmra.mrb[4].mxu0 %vm132_vm0, %v120_v62 }
  0x7c   :  { %2607 = vmatprep.mubr.msk.f32.mxu0 %vm132_vm0, %v121_v63 }
 0x146   :  { %v2600_v6 = vpop.f32.mrb[0].mxu0 }
 0x147   :  { %v223_v7 = vpop.f32.mrb[1].mxu0  ;;  %v229_v36 = vadd.f32 %v2600_v6, %v3495_v5 }
 0x148   :  { %v224_v8 = vadd.f32 %v3495_v5, %v223_v7  ;;  %v122_v7 = vld [vmem:[#allocation3 + $0x38] sm:$0xff] }
 0x149   :  { %2608 = vmatmul.mubr.msk.f32.gmra.mrb[6].mxu0 %vm132_vm0, %v122_v7 }
 0x14a   :  { %3020 = vtanh.f32 %v224_v8  ;;  %v2429_v10 = vmul.f32 -1.442695, %v224_v8  ;;  %v3555_v8 = vpack.c.bf16 %v502_v4, %v501_v3  ;;  %2640 = vmatprep.mubr.msk.f32.mxu0 %vm3324_vm1, %v3325_v22 }
 0x14c   :  { %3022 = vpow2.f32 %v2429_v10  ;;  %2884 = vmatpush3.bf16.msra.mxu0 %v3555_v8 }
 0x14d   :  { %2891 = vmatprep.subr.bf16.mxu0 %v3323_v19 }
 0x154   :  { %v3021_v9 = vpop.eup %3020 }
 0x155   :  { %286 = vrot.lane.b32.xlu0 %v3021_v9, %s3322_s22 }
 0x156   :  { %v3023_v11 = vpop.eup %3022 }
 0x157   :  { %v281_v12 = vadd.f32 1.0, %v3023_v11 }
 0x159   :  { %3024 = vrcp.f32 %v281_v12 }
 0x163   :  { %v3025_v13 = vpop.eup %3024 }
 0x1c7   :  { %v287_v14 = vpop.permute.xlu0 %286 }
 0x1c8   :  { %v289_v15 = vmul.f32 %v3025_v13, %v287_v14 }
 0x1ca   :  { %3026 = vtanh.f32 %v289_v15 }
 0x1d4   :  { %v3027_v24 = vpop.eup %3026 }
 0x1d5   :  { %292 = vrot.lane.b32.xlu0 %v3027_v24, %s3326_s16 }
 0x1d9   :  { %479 = vrot.lane.b32.xlu0 %v289_v15, %s3327_s18 }
 0x247   :  { %v293_v25 = vpop.permute.xlu0 %292 }
 0x248   :  { %v295_v26 = vmul.f32 %v3025_v13, %v293_v25  ;;  %v3567_v13 = vpop.f32.mrb[2].mxu0 }
 0x249   :  { %v233_v14 = vpop.f32.mrb[3].mxu0 }
 0x24a   :  { %301 = vrot.lane.b32.xlu1 %v295_v26, %s3327_s18  ;;  %v3569_v15 = vpop.f32.mrb[4].mxu0  ;;  %v234_v30 = vadd.f32 %v3495_v5, %v233_v14 }
 0x24b   :  { %v480_v1 = vpop.permute.xlu0 %479  ;;  %v3571_v16 = vpop.f32.mrb[5].mxu0 }
 0x24c   :  { %v3581_v24 = vpop.f32.mrb[6].mxu0 }
 0x24d   :  { %v3583_v25 = vpop.f32.mrb[7].mxu0 }
 0x2bc   :  { %v302_v32 = vpop.permute.xlu1 %301 }
 0x2bd   :  { %2619 = vmatmul.mubr.msk.f32.vlgmr.msra.gmra.mrb[0].mxu1 %vm303_vm2, %v302_v32 }
 0x2be   :  { %2875 = vmatpush3.bf16.msra.mxu1 %v3514_v29  ;;  %2629 = vmatprep.mubr.msk.f32.mxu1 %vm3324_vm1, %v3325_v22 }
 0x2bf   :  { %2876 = vmatprep.subr.bf16.mxu1 %v3323_v19 }
 0x2c2   :  { %2878 = vmatpush3.bf16.msra.mxu1 %v3518_v33 }
 0x2c3   :  { %2885 = vmatprep.subr.bf16.mxu1 %v3323_v19 }
 0x2c5   :  { %2630 = vmatmul.mubr.msk.f32.vlgmr.msra.gmra.mrb[2].mxu1 %vm303_vm2, %v302_v32 }
 0x2c6   :  { %2887 = vmatpush3.bf16.msra.mxu1 %v3500_v20  ;;  %2651 = vmatprep.mubr.msk.f32.mxu1 %vm3324_vm1, %v3325_v22 }
 0x2c7   :  { %2888 = vmatprep.subr.bf16.mxu1 %v3323_v19 }
 0x2ca   :  { %2890 = vmatpush3.bf16.msra.mxu1 %v3506_v23 }
 0x2cb   :  { %2897 = vmatprep.subr.bf16.mxu1 %v3323_v19 }
 0x390   :  { %v372_v34 = vpop.f32.mrb[0].mxu1 }
 0x391   :  { %v2620_v35 = vpop.f32.mrb[1].mxu1  ;;  %v373_v41 = vadd.f32 %v3536_v37, %v372_v34 }
 0x393   :  { %v2431_v45 = vmul.f32 -1.442695, %v373_v41 }
 0x398   :  { %v466_v38 = vpop.f32.mrb[2].mxu1 }
 0x399   :  { %v470_v39 = vadd.f32 %v466_v38, %v229_v36  ;;  %v2631_v40 = vpop.f32.mrb[3].mxu1 }
 0x39b   :  { %3028 = vtanh.f32 %v470_v39  ;;  %v2433_v44 = vmul.f32 -1.442695, %v470_v39 }
 0x39c   :  { %3030 = vtanh.f32 %v373_v41 }
 0x39d   :  { %3032 = vpow2.f32 %v2433_v44 }
 0x39e   :  { %3034 = vpow2.f32 %v2431_v45 }
 0x3a5   :  { %v3029_v42 = vpop.eup %3028 }
 0x3a6   :  { %484 = vrot.lane.b32.xlu1 %v3029_v42, %s3322_s22  ;;  %v3031_v43 = vpop.eup %3030 }
 0x3a7   :  { %v3033_v46 = vpop.eup %3032 }
 0x3a8   :  { %v474_v47 = vadd.f32 1.0, %v3033_v46  ;;  %v3035_v48 = vpop.eup %3034 }
 0x3a9   :  { %v379_v49 = vadd.f32 1.0, %v3035_v48 }
 0x3aa   :  { %384 = vrot.lane.b32.xlu1 %v3031_v43, %s3322_s22  ;;  %3036 = vrcp.f32 %v474_v47 }
 0x3ab   :  { %3038 = vrcp.f32 %v379_v49 }
 0x3b4   :  { %v3037_v50 = vpop.eup %3036 }
 0x3b5   :  { %v3039_v53 = vpop.eup %3038  ;;  %v482_v2 = vmul.f32 %v3037_v50, %v480_v1 }
 0x418   :  { %v485_v51 = vpop.permute.xlu1 %484 }
 0x419   :  { %v487_v52 = vmul.f32 %v3037_v50, %v485_v51 }
 0x41b   :  { %489 = vrot.lane.b32.xlu0 %v487_v52, %s3327_s18 }
 0x41c   :  { %v385_v54 = vpop.permute.xlu1 %384 }
 0x41d   :  { %v3542_v55 = vmul.f32 %v3039_v53, %v385_v54 }
 0x41f   :  { %3040 = vtanh.f32 %v3542_v55 }
 0x429   :  { %v3041_v0 = vpop.eup %3040 }
 0x42a   :  { %390 = vrot.lane.b32.xlu1 %v3041_v0, %s3326_s16 }
 0x48d   :  { %v490_v6 = vpop.permute.xlu0 %489 }
 0x48e   :  { %v3557_v9 = vadd.f32 %v490_v6, %v482_v2 }
 0x490   :  { %3042 = vtanh.f32 %v3557_v9 }
 0x49a   :  { %v3043_v10 = vpop.eup %3042 }
 0x49b   :  { %495 = vrot.lane.b32.xlu0 %v3043_v10, %s3322_s22 }
 0x49c   :  { %v391_v11 = vpop.permute.xlu1 %390 }
 0x49d   :  { %v393_v12 = vmul.f32 %v3039_v53, %v391_v11 }
 0x49f   :  { %504 = vrot.lane.b32.xlu1 %v393_v12, %s3327_s18 }
 0x50d   :  { %v496_v17 = vpop.permute.xlu0 %495 }
 0x50e   :  { %v498_v18 = vmul.f32 %v3037_v50, %v496_v17  ;;  %v239_v17 = vadd.f32 %v3567_v13, %v3495_v5 }
 0x510   :  { %579 = vrot.lane.b32.xlu0 %v498_v18, %s3327_s18 }
 0x511   :  { %v505_v21 = vpop.permute.xlu1 %504 }
 0x512   :  { %2641 = vmatmul.mubr.msk.f32.vlgmr.msra.gmra.mrb[8].mxu0 %vm303_vm2, %v505_v21 }
 0x513   :  { %2893 = vmatpush3.bf16.msra.mxu0 %v3514_v29  ;;  %2662 = vmatprep.mubr.msk.f32.mxu0 %vm3324_vm1, %v3325_v22 }
 0x514   :  { %2894 = vmatprep.subr.bf16.mxu0 %v3323_v19 }
 0x517   :  { %2896 = vmatpush3.bf16.msra.mxu0 %v3518_v33 }
 0x518   :  { %2903 = vmatprep.subr.bf16.mxu0 %v3323_v19 }
 0x582   :  { %v580_v26 = vpop.permute.xlu0 %579 }
 0x583   :  { %2652 = vmatmul.mubr.msk.f32.vlgmr.msra.gmra.mrb[4].mxu1 %vm303_vm2, %v580_v26  ;;  %2663 = vmatmul.mubr.msk.f32.vlgmr.msra.gmra.mrb[10].mxu0 %vm303_vm2, %v580_v26 }
 0x584   :  { %2905 = vmatpush3.bf16.msra.mxu0 %v3500_v20  ;;  %2899 = vmatpush3.bf16.msra.mxu1 %v3547_v61 }
 0x585   :  { %2906 = vmatprep.subr.bf16.mxu0 %v3323_v19  ;;  %2900 = vmatprep.subr.bf16.mxu1 %v3323_v19 }
 0x586   :  { %2684 = vmatprep.mubr.msk.f32.mxu0 %vm3324_vm1, %v3325_v22  ;;  %2673 = vmatprep.mubr.msk.f32.mxu1 %vm3324_vm1, %v3325_v22 }
 0x588   :  { %2908 = vmatpush3.bf16.msra.mxu0 %v3506_v23  ;;  %2902 = vmatpush3.bf16.msra.mxu1 %v3555_v8 }
 0x589   :  { %2909 = vmatprep.subr.bf16.mxu1 %v3323_v19  ;;  %2915 = vmatprep.subr.bf16.mxu0 %v3323_v19 }
 0x5e5   :  { %v574_v27 = vpop.f32.mrb[8].mxu0 }
 0x5e6   :  { %v2642_v28 = vpop.f32.mrb[9].mxu0 }
 0x656   :  { %v649_v31 = vpop.f32.mrb[4].mxu1  ;;  %v750_v32 = vpop.f32.mrb[10].mxu0 }
 0x657   :  { %v650_v34 = vadd.f32 %v649_v31, %v574_v27  ;;  %v754_v35 = vadd.f32 %v750_v32, %v234_v30  ;;  %v2653_v36 = vpop.f32.mrb[5].mxu1  ;;  %v2664_v38 = vpop.f32.mrb[11].mxu0 }
 0x659   :  { %v653_v39 = vadd.f32 %v3536_v37, %v650_v34  ;;  %3044 = vtanh.f32 %v754_v35  ;;  %v2438_v42 = vmul.f32 -1.442695, %v754_v35 }
 0x65b   :  { %3046 = vtanh.f32 %v653_v39  ;;  %v2436_v43 = vmul.f32 -1.442695, %v653_v39 }
 0x65c   :  { %3048 = vpow2.f32 %v2438_v42 }
 0x65d   :  { %3050 = vpow2.f32 %v2436_v43 }
 0x663   :  { %v3045_v40 = vpop.eup %3044 }
 0x664   :  { %764 = vrot.lane.b32.xlu0 %v3045_v40, %s3322_s22 }
 0x665   :  { %v3047_v41 = vpop.eup %3046 }
 0x666   :  { %667 = vrot.lane.b32.xlu1 %v3047_v41, %s3322_s22  ;;  %v3049_v44 = vpop.eup %3048 }
 0x667   :  { %v3051_v45 = vpop.eup %3050  ;;  %v758_v46 = vadd.f32 1.0, %v3049_v44 }
 0x668   :  { %v657_v47 = vadd.f32 1.0, %v3051_v45 }
 0x669   :  { %3052 = vrcp.f32 %v758_v46 }
 0x66a   :  { %662 = vrot.lane.b32.xlu1 %v3542_v55, %s3327_s18  ;;  %3054 = vrcp.f32 %v657_v47 }
 0x673   :  { %v3053_v48 = vpop.eup %3052 }
 0x674   :  { %v3055_v51 = vpop.eup %3054  ;;  %v762_v55 = vmul.f32 %v3053_v48, %v3557_v9 }
 0x6d6   :  { %v765_v49 = vpop.permute.xlu0 %764 }
 0x6d7   :  { %v767_v50 = vmul.f32 %v3053_v48, %v765_v49 }
 0x6d8   :  { %v668_v52 = vpop.permute.xlu1 %667 }
 0x6d9   :  { %v670_v53 = vmul.f32 %v3055_v51, %v668_v52  ;;  %769 = vrot.lane.b32.xlu1 %v767_v50, %s3327_s18 }
 0x6db   :  { %672 = vrot.lane.b32.xlu0 %v670_v53, %s3327_s18 }
 0x6dc   :  { %v663_v54 = vpop.permute.xlu1 %662 }
 0x6dd   :  { %v665_v57 = vmul.f32 %v3055_v51, %v663_v54 }
 0x74b   :  { %v770_v56 = vpop.permute.xlu1 %769 }
 0x74c   :  { %v3608_v58 = vadd.f32 %v770_v56, %v762_v55 }
 0x74d   :  { %v673_v59 = vpop.permute.xlu0 %672 }
 0x74e   :  { %3056 = vtanh.f32 %v3608_v58  ;;  %v3611_v60 = vadd.f32 %v673_v59, %v665_v57 }
 0x750   :  { %3058 = vtanh.f32 %v3611_v60 }
 0x758   :  { %v3057_v62 = vpop.eup %3056 }
 0x759   :  { %775 = vrot.lane.b32.xlu1 %v3057_v62, %s3322_s22 }
 0x75a   :  { %v3059_v63 = vpop.eup %3058 }
 0x75b   :  { %678 = vrot.lane.b32.xlu0 %v3059_v63, %s3322_s22 }
 0x7cb   :  { %v776_v0 = vpop.permute.xlu1 %775 }
 0x7cc   :  { %v778_v1 = vmul.f32 %v3053_v48, %v776_v0 }
 0x7cd   :  { %v679_v2 = vpop.permute.xlu0 %678 }
 0x7ce   :  { %v681_v3 = vmul.f32 %v3055_v51, %v679_v2  ;;  %855 = vrot.lane.b32.xlu1 %v778_v1, %s3327_s18 }
 0x7d0   :  { %780 = vrot.lane.b32.xlu0 %v681_v3, %s3327_s18 }
 0x840   :  { %v856_v4 = vpop.permute.xlu1 %855 }
 0x841   :  { %2685 = vmatmul.mubr.msk.f32.vlgmr.msra.gmra.mrb[12].mxu0 %vm303_vm2, %v856_v4 }
 0x842   :  { %v781_v6 = vpop.permute.xlu0 %780  ;;  %2917 = vmatpush3.bf16.msra.mxu0 %v3547_v61  ;;  %2706 = vmatprep.mubr.msk.f32.mxu0 %vm3324_vm1, %v3325_v22 }
 0x843   :  { %2674 = vmatmul.mubr.msk.f32.vlgmr.msra.gmra.mrb[6].mxu1 %vm303_vm2, %v781_v6  ;;  %2918 = vmatprep.subr.bf16.mxu0 %v3323_v19 }
 0x844   :  { %2911 = vmatpush3.bf16.msra.mxu1 %v3514_v29  ;;  %2695 = vmatprep.mubr.msk.f32.mxu1 %vm3324_vm1, %v3325_v22 }
 0x845   :  { %2912 = vmatprep.subr.bf16.mxu1 %v3323_v19 }
 0x846   :  { %2920 = vmatpush3.bf16.msra.mxu0 %v3555_v8 }
 0x847   :  { %2927 = vmatprep.subr.bf16.mxu0 %v3323_v19 }
 0x848   :  { %2914 = vmatpush3.bf16.msra.mxu1 %v3518_v33 }
 0x849   :  { %2921 = vmatprep.subr.bf16.mxu1 %v3323_v19 }
 0x84b   :  { %2696 = vmatmul.mubr.msk.f32.vlgmr.msra.gmra.mrb[8].mxu1 %vm303_vm2, %v856_v4 }
 0x84c   :  { %2923 = vmatpush3.bf16.msra.mxu1 %v3500_v20  ;;  %2717 = vmatprep.mubr.msk.f32.mxu1 %vm3324_vm1, %v3325_v22 }
 0x84d   :  { %2924 = vmatprep.subr.bf16.mxu1 %v3323_v19 }
 0x850   :  { %2926 = vmatpush3.bf16.msra.mxu1 %v3506_v23 }
 0x851   :  { %2933 = vmatprep.subr.bf16.mxu1 %v3323_v19 }
 0x914   :  { %v925_v7 = vpop.f32.mrb[12].mxu0 }
 0x915   :  { %v2686_v9 = vpop.f32.mrb[13].mxu0 }
 0x916   :  { %v850_v10 = vpop.f32.mrb[6].mxu1 }
 0x917   :  { %v926_v11 = vadd.f32 %v925_v7, %v850_v10  ;;  %v2675_v12 = vpop.f32.mrb[7].mxu1 }
 0x919   :  { %v929_v14 = vadd.f32 %v3536_v37, %v926_v11 }
 0x91b   :  { %3060 = vtanh.f32 %v929_v14  ;;  %v2441_v30 = vmul.f32 -1.442695, %v929_v14 }
 0x91e   :  { %v1022_v18 = vpop.f32.mrb[8].mxu1 }
 0x91f   :  { %v1026_v21 = vadd.f32 %v1022_v18, %v239_v17  ;;  %v2697_v26 = vpop.f32.mrb[9].mxu1 }
 0x921   :  { %3062 = vtanh.f32 %v1026_v21  ;;  %v2443_v31 = vmul.f32 -1.442695, %v1026_v21 }
 0x922   :  { %3064 = vpow2.f32 %v2441_v30 }
 0x923   :  { %3066 = vpow2.f32 %v2443_v31 }
 0x925   :  { %v3061_v27 = vpop.eup %3060 }
 0x926   :  { %939 = vrot.lane.b32.xlu0 %v3061_v27, %s3322_s22 }
 0x92b   :  { %v3063_v28 = vpop.eup %3062 }
 0x92c   :  { %1036 = vrot.lane.b32.xlu1 %v3063_v28, %s3322_s22  ;;  %v3065_v32 = vpop.eup %3064 }
 0x92d   :  { %v933_v34 = vadd.f32 1.0, %v3065_v32  ;;  %v3067_v35 = vpop.eup %3066 }
 0x92e   :  { %v1030_v36 = vadd.f32 1.0, %v3067_v35 }
 0x92f   :  { %3068 = vrcp.f32 %v933_v34 }
 0x930   :  { %3070 = vrcp.f32 %v1030_v36 }
 0x939   :  { %v3069_v13 = vpop.eup %3068 }
 0x93a   :  { %v3071_v40 = vpop.eup %3070  ;;  %v937_v43 = vmul.f32 %v3069_v13, %v3611_v60  ;;  %v244_v60 = vadd.f32 %v3495_v5, %v3571_v16 }
 0x93b   :  { %v1034_v46 = vmul.f32 %v3071_v40, %v3608_v58 }
 0x998   :  { %v940_v38 = vpop.permute.xlu0 %939 }
 0x999   :  { %v942_v39 = vmul.f32 %v3069_v13, %v940_v38 }
 0x99b   :  { %944 = vrot.lane.b32.xlu0 %v942_v39, %s3327_s18 }
 0x99e   :  { %v1037_v41 = vpop.permute.xlu1 %1036 }
 0x99f   :  { %v1039_v42 = vmul.f32 %v3071_v40, %v1037_v41 }
 0x9a1   :  { %1041 = vrot.lane.b32.xlu1 %v1039_v42, %s3327_s18 }
 0xa0d   :  { %v945_v44 = vpop.permute.xlu0 %944 }
 0xa0e   :  { %v3647_v45 = vadd.f32 %v945_v44, %v937_v43 }
 0xa10   :  { %3072 = vtanh.f32 %v3647_v45 }
 0xa13   :  { %v1042_v47 = vpop.permute.xlu1 %1041 }
 0xa14   :  { %v3651_v48 = vadd.f32 %v1042_v47, %v1034_v46 }
 0xa16   :  { %3074 = vtanh.f32 %v3651_v48 }
 0xa1a   :  { %v3073_v49 = vpop.eup %3072 }
 0xa1b   :  { %950 = vrot.lane.b32.xlu0 %v3073_v49, %s3322_s22 }
 0xa20   :  { %v3075_v50 = vpop.eup %3074 }
 0xa21   :  { %1047 = vrot.lane.b32.xlu1 %v3075_v50, %s3322_s22  ;;  %v249_v50 = vadd.f32 %v3569_v15, %v3495_v5 }
 0xa8d   :  { %v951_v51 = vpop.permute.xlu0 %950 }
 0xa8e   :  { %v953_v52 = vmul.f32 %v3069_v13, %v951_v51 }
 0xa90   :  { %1052 = vrot.lane.b32.xlu0 %v953_v52, %s3327_s18 }
 0xa93   :  { %v1048_v53 = vpop.permute.xlu1 %1047 }
 0xa94   :  { %v1050_v54 = vmul.f32 %v3071_v40, %v1048_v53 }
 0xa96   :  { %1127 = vrot.lane.b32.xlu1 %v1050_v54, %s3327_s18 }
 0xb02   :  { %v1053_v55 = vpop.permute.xlu0 %1052 }
 0xb03   :  { %2707 = vmatmul.mubr.msk.f32.vlgmr.msra.gmra.mrb[14].mxu0 %vm303_vm2, %v1053_v55 }
 0xb04   :  { %2929 = vmatpush3.bf16.msra.mxu0 %v3514_v29  ;;  %2728 = vmatprep.mubr.msk.f32.mxu0 %vm3324_vm1, %v3325_v22 }
 0xb05   :  { %2930 = vmatprep.subr.bf16.mxu0 %v3323_v19 }
 0xb08   :  { %2932 = vmatpush3.bf16.msra.mxu0 %v3518_v33  ;;  %v1128_v56 = vpop.permute.xlu1 %1127 }
 0xb09   :  { %2718 = vmatmul.mubr.msk.f32.vlgmr.msra.gmra.mrb[10].mxu1 %vm303_vm2, %v1128_v56  ;;  %2939 = vmatprep.subr.bf16.mxu0 %v3323_v19 }
 0xb0a   :  { %2935 = vmatpush3.bf16.msra.mxu1 %v3547_v61  ;;  %2739 = vmatprep.mubr.msk.f32.mxu1 %vm3324_vm1, %v3325_v22 }
 0xb0b   :  { %2729 = vmatmul.mubr.msk.f32.vlgmr.msra.gmra.mrb[16].mxu0 %vm303_vm2, %v1128_v56  ;;  %2936 = vmatprep.subr.bf16.mxu1 %v3323_v19 }
 0xb0c   :  { %2941 = vmatpush3.bf16.msra.mxu0 %v3500_v20  ;;  %2750 = vmatprep.mubr.msk.f32.mxu0 %vm3324_vm1, %v3325_v22 }
 0xb0d   :  { %2942 = vmatprep.subr.bf16.mxu0 %v3323_v19 }
 0xb0e   :  { %2938 = vmatpush3.bf16.msra.mxu1 %v3555_v8 }
 0xb0f   :  { %2945 = vmatprep.subr.bf16.mxu1 %v3323_v19 }
 0xb10   :  { %2944 = vmatpush3.bf16.msra.mxu0 %v3506_v23 }
 0xb11   :  { %2951 = vmatprep.subr.bf16.mxu0 %v3323_v19 }
 0xbd6   :  { %v1122_v57 = vpop.f32.mrb[14].mxu0 }
 0xbd7   :  { %v2708_v58 = vpop.f32.mrb[15].mxu0 }
 0xbdc   :  { %v1197_v59 = vpop.f32.mrb[10].mxu1 }
 0xbdd   :  { %v1198_v62 = vadd.f32 %v1197_v59, %v1122_v57  ;;  %v2719_v63 = vpop.f32.mrb[11].mxu1 }
 0xbde   :  { %v1294_v0 = vpop.f32.mrb[16].mxu0 }
 0xbdf   :  { %v1201_v1 = vadd.f32 %v3536_v37, %v1198_v62  ;;  %v1298_v2 = vadd.f32 %v1294_v0, %v244_v60  ;;  %v2730_v3 = vpop.f32.mrb[17].mxu0 }
 0xbe1   :  { %3076 = vtanh.f32 %v1201_v1  ;;  %v2446_v7 = vmul.f32 -1.442695, %v1201_v1  ;;  %v2448_v9 = vmul.f32 -1.442695, %v1298_v2 }
 0xbe2   :  { %3078 = vtanh.f32 %v1298_v2 }
 0xbe3   :  { %3080 = vpow2.f32 %v2446_v7 }
 0xbe4   :  { %3082 = vpow2.f32 %v2448_v9 }
 0xbeb   :  { %v3077_v4 = vpop.eup %3076 }
 0xbec   :  { %v3079_v6 = vpop.eup %3078  ;;  %1211 = vrot.lane.b32.xlu0 %v3077_v4, %s3322_s22 }
 0xbed   :  { %1308 = vrot.lane.b32.xlu1 %v3079_v6, %s3322_s22  ;;  %v3081_v16 = vpop.eup %3080 }
 0xbee   :  { %v3083_v10 = vpop.eup %3082  ;;  %v1205_v11 = vadd.f32 1.0, %v3081_v16 }
 0xbef   :  { %v1302_v12 = vadd.f32 1.0, %v3083_v10 }
 0xbf0   :  { %3084 = vrcp.f32 %v1205_v11 }
 0xbf1   :  { %3086 = vrcp.f32 %v1302_v12 }
 0xbfa   :  { %v3085_v14 = vpop.eup %3084 }
 0xbfb   :  { %v3087_v18 = vpop.eup %3086  ;;  %v1209_v28 = vmul.f32 %v3085_v14, %v3647_v45 }
 0xbfc   :  { %v1306_v30 = vmul.f32 %v3087_v18, %v3651_v48 }
 0xc5e   :  { %v1212_v17 = vpop.permute.xlu0 %1211 }
 0xc5f   :  { %v1309_v21 = vpop.permute.xlu1 %1308  ;;  %v1214_v26 = vmul.f32 %v3085_v14, %v1212_v17 }
 0xc60   :  { %v1311_v27 = vmul.f32 %v3087_v18, %v1309_v21 }
 0xc61   :  { %1216 = vrot.lane.b32.xlu0 %v1214_v26, %s3327_s18 }
 0xc62   :  { %1313 = vrot.lane.b32.xlu1 %v1311_v27, %s3327_s18 }
 0xcd3   :  { %v1217_v31 = vpop.permute.xlu0 %1216 }
 0xcd4   :  { %v1314_v32 = vpop.permute.xlu1 %1313  ;;  %v3688_v34 = vadd.f32 %v1217_v31, %v1209_v28 }
 0xcd5   :  { %v3690_v35 = vadd.f32 %v1314_v32, %v1306_v30 }
 0xcd6   :  { %3088 = vtanh.f32 %v3688_v34 }
 0xcd7   :  { %3090 = vtanh.f32 %v3690_v35 }
 0xce0   :  { %v3089_v36 = vpop.eup %3088 }
 0xce1   :  { %v3091_v13 = vpop.eup %3090  ;;  %1222 = vrot.lane.b32.xlu0 %v3089_v36, %s3322_s22 }
 0xce2   :  { %1319 = vrot.lane.b32.xlu1 %v3091_v13, %s3322_s22 }
 0xd53   :  { %v1223_v38 = vpop.permute.xlu0 %1222 }
 0xd54   :  { %v1320_v39 = vpop.permute.xlu1 %1319  ;;  %v1225_v40 = vmul.f32 %v3085_v14, %v1223_v38 }
 0xd55   :  { %v1322_v41 = vmul.f32 %v3087_v18, %v1320_v39 }
 0xd56   :  { %1324 = vrot.lane.b32.xlu0 %v1225_v40, %s3327_s18 }
 0xd57   :  { %1399 = vrot.lane.b32.xlu1 %v1322_v41, %s3327_s18 }
 0xdc8   :  { %v1325_v42 = vpop.permute.xlu0 %1324 }
 0xdc9   :  { %v1400_v43 = vpop.permute.xlu1 %1399  ;;  %2740 = vmatmul.mubr.msk.f32.vlgmr.msra.gmra.mrb[12].mxu1 %vm303_vm2, %v1325_v42 }
 0xdca   :  { %2751 = vmatmul.mubr.msk.f32.vlgmr.msra.gmra.mrb[18].mxu0 %vm303_vm2, %v1400_v43  ;;  %2947 = vmatpush3.bf16.msra.mxu1 %v3514_v29 }
 0xdcb   :  { %2948 = vmatprep.subr.bf16.mxu1 %v3323_v19  ;;  %2761 = vmatprep.mubr.msk.f32.mxu1 %vm3324_vm1, %v3325_v22 }
 0xdcc   :  { %2953 = vmatpush3.bf16.msra.mxu0 %v3547_v61  ;;  %2772 = vmatprep.mubr.msk.f32.mxu0 %vm3324_vm1, %v3325_v22 }
 0xdcd   :  { %2954 = vmatprep.subr.bf16.mxu0 %v3323_v19 }
 0xdce   :  { %2950 = vmatpush3.bf16.msra.mxu1 %v3518_v33 }
 0xdcf   :  { %2957 = vmatprep.subr.bf16.mxu1 %v3323_v19 }
 0xdd0   :  { %2956 = vmatpush3.bf16.msra.mxu0 %v3555_v8 }
 0xdd1   :  { %2762 = vmatmul.mubr.msk.f32.vlgmr.msra.gmra.mrb[14].mxu1 %vm303_vm2, %v1400_v43  ;;  %2963 = vmatprep.subr.bf16.mxu0 %v3323_v19 }
 0xdd2   :  { %2959 = vmatpush3.bf16.msra.mxu1 %v3500_v20  ;;  %2783 = vmatprep.mubr.msk.f32.mxu1 %vm3324_vm1, %v3325_v22 }
 0xdd3   :  { %2960 = vmatprep.subr.bf16.mxu1 %v3323_v19 }
 0xdd6   :  { %2962 = vmatpush3.bf16.msra.mxu1 %v3506_v23 }
 0xdd7   :  { %2969 = vmatprep.subr.bf16.mxu1 %v3323_v19 }
 0xe9c   :  { %v1394_v44 = vpop.f32.mrb[12].mxu1 }
 0xe9d   :  { %v1469_v45 = vpop.f32.mrb[18].mxu0  ;;  %v2741_v46 = vpop.f32.mrb[13].mxu1 }
 0xe9e   :  { %v1470_v47 = vadd.f32 %v1469_v45, %v1394_v44  ;;  %v2752_v48 = vpop.f32.mrb[19].mxu0 }
 0xea0   :  { %v1473_v49 = vadd.f32 %v3536_v37, %v1470_v47 }
 0xea2   :  { %3092 = vtanh.f32 %v1473_v49  ;;  %v2451_v56 = vmul.f32 -1.442695, %v1473_v49 }
 0xea4   :  { %v1566_v51 = vpop.f32.mrb[14].mxu1 }
 0xea5   :  { %v1570_v52 = vadd.f32 %v1566_v51, %v249_v50  ;;  %v2763_v53 = vpop.f32.mrb[15].mxu1 }
 0xea7   :  { %3094 = vtanh.f32 %v1570_v52  ;;  %v2453_v57 = vmul.f32 -1.442695, %v1570_v52 }
 0xea8   :  { %3096 = vpow2.f32 %v2451_v56 }
 0xea9   :  { %3098 = vpow2.f32 %v2453_v57 }
 0xeac   :  { %v3093_v54 = vpop.eup %3092 }
 0xead   :  { %1483 = vrot.lane.b32.xlu0 %v3093_v54, %s3322_s22 }
 0xeb1   :  { %v3095_v55 = vpop.eup %3094 }
 0xeb2   :  { %1580 = vrot.lane.b32.xlu1 %v3095_v55, %s3322_s22  ;;  %v3097_v58 = vpop.eup %3096 }
 0xeb3   :  { %v1477_v59 = vadd.f32 1.0, %v3097_v58  ;;  %v3099_v60 = vpop.eup %3098 }
 0xeb4   :  { %v1574_v62 = vadd.f32 1.0, %v3099_v60 }
 0xeb5   :  { %3100 = vrcp.f32 %v1477_v59 }
 0xeb6   :  { %3102 = vrcp.f32 %v1574_v62 }
 0xebf   :  { %v3101_v15 = vpop.eup %3100 }
 0xec0   :  { %v3103_v1 = vpop.eup %3102  ;;  %v1481_v4 = vmul.f32 %v3101_v15, %v3688_v34 }
 0xec1   :  { %v1578_v9 = vmul.f32 %v3103_v1, %v3690_v35  ;;  %v254_v35 = vadd.f32 %v3495_v5, %v3583_v25 }
 0xf1f   :  { %v1484_v63 = vpop.permute.xlu0 %1483 }
 0xf20   :  { %v1486_v0 = vmul.f32 %v3101_v15, %v1484_v63 }
 0xf22   :  { %1488 = vrot.lane.b32.xlu0 %v1486_v0, %s3327_s18 }
 0xf24   :  { %v1581_v2 = vpop.permute.xlu1 %1580 }
 0xf25   :  { %v1583_v3 = vmul.f32 %v3103_v1, %v1581_v2 }
 0xf27   :  { %1585 = vrot.lane.b32.xlu1 %v1583_v3, %s3327_s18 }
 0xf94   :  { %v1489_v6 = vpop.permute.xlu0 %1488 }
 0xf95   :  { %v3727_v7 = vadd.f32 %v1489_v6, %v1481_v4  ;;  %v3148_v4 = vld [vmem:[%s3844_s3] ss:$0 sm:$0xff] }
 0xf97   :  { %3104 = vtanh.f32 %v3727_v7 }
 0xf99   :  { %v1586_v16 = vpop.permute.xlu1 %1585 }
 0xf9a   :  { %v3731_v10 = vadd.f32 %v1586_v16, %v1578_v9 }
 0xf9c   :  { %3106 = vtanh.f32 %v3731_v10 }
 0xfa1   :  { %v3105_v11 = vpop.eup %3104 }
 0xfa2   :  { %1494 = vrot.lane.b32.xlu0 %v3105_v11, %s3322_s22 }
 0xfa6   :  { %v3107_v12 = vpop.eup %3106 }
 0xfa7   :  { %1591 = vrot.lane.b32.xlu1 %v3107_v12, %s3322_s22 }
0x1014   :  { %v1495_v14 = vpop.permute.xlu0 %1494 }
0x1015   :  { %v1497_v17 = vmul.f32 %v3101_v15, %v1495_v14 }
0x1017   :  { %1596 = vrot.lane.b32.xlu0 %v1497_v17, %s3327_s18 }
0x1019   :  { %v1592_v18 = vpop.permute.xlu1 %1591 }
0x101a   :  { %v1594_v21 = vmul.f32 %v3103_v1, %v1592_v18 }
0x101c   :  { %1671 = vrot.lane.b32.xlu1 %v1594_v21, %s3327_s18 }
0x1089   :  { %v1597_v26 = vpop.permute.xlu0 %1596 }
0x108a   :  { %2773 = vmatmul.mubr.msk.f32.vlgmr.msra.gmra.mrb[20].mxu0 %vm303_vm2, %v1597_v26 }
0x108b   :  { %2965 = vmatpush3.bf16.msra.mxu0 %v3514_v29  ;;  %2794 = vmatprep.mubr.msk.f32.mxu0 %vm3324_vm1, %v3325_v22 }
0x108c   :  { %2966 = vmatprep.subr.bf16.mxu0 %v3323_v19 }
0x108e   :  { %v1672_v27 = vpop.permute.xlu1 %1671 }
0x108f   :  { %2968 = vmatpush3.bf16.msra.mxu0 %v3518_v33  ;;  %2784 = vmatmul.mubr.msk.f32.vlgmr.msra.gmra.mrb[16].mxu1 %vm303_vm2, %v1672_v27 }
0x1090   :  { %2971 = vmatpush3.bf16.msra.mxu1 %v3547_v61  ;;  %2975 = vmatprep.subr.bf16.mxu0 %v3323_v19 }
0x1091   :  { %2972 = vmatprep.subr.bf16.mxu1 %v3323_v19  ;;  %2805 = vmatprep.mubr.msk.f32.mxu1 %vm3324_vm1, %v3325_v22 }
0x1092   :  { %2795 = vmatmul.mubr.msk.f32.vlgmr.msra.gmra.mrb[22].mxu0 %vm303_vm2, %v1672_v27 }
0x1093   :  { %2977 = vmatpush3.bf16.msra.mxu0 %v3500_v20  ;;  %2816 = vmatprep.mubr.msk.f32.mxu0 %vm3324_vm1, %v3325_v22 }
0x1094   :  { %2974 = vmatpush3.bf16.msra.mxu1 %v3555_v8  ;;  %2978 = vmatprep.subr.bf16.mxu0 %v3323_v19 }
0x1095   :  { %2981 = vmatprep.subr.bf16.mxu1 %v3323_v19 }
0x1097   :  { %2980 = vmatpush3.bf16.msra.mxu0 %v3506_v23 }
0x1098   :  { %2987 = vmatprep.subr.bf16.mxu0 %v3323_v19 }
0x115d   :  { %v1666_v28 = vpop.f32.mrb[20].mxu0 }
0x115e   :  { %v2774_v30 = vpop.f32.mrb[21].mxu0 }
0x1162   :  { %v1741_v31 = vpop.f32.mrb[16].mxu1 }
0x1163   :  { %v1742_v32 = vadd.f32 %v1741_v31, %v1666_v28  ;;  %v2785_v34 = vpop.f32.mrb[17].mxu1 }
0x1165   :  { %v1745_v36 = vadd.f32 %v3536_v37, %v1742_v32  ;;  %v1838_v13 = vpop.f32.mrb[22].mxu0 }
0x1166   :  { %v1842_v38 = vadd.f32 %v1838_v13, %v254_v35  ;;  %v2796_v39 = vpop.f32.mrb[23].mxu0 }
0x1167   :  { %3108 = vtanh.f32 %v1745_v36  ;;  %v2456_v42 = vmul.f32 -1.442695, %v1745_v36 }
0x1168   :  { %3110 = vtanh.f32 %v1842_v38  ;;  %v2458_v43 = vmul.f32 -1.442695, %v1842_v38 }
0x1169   :  { %3112 = vpow2.f32 %v2456_v42 }
0x116a   :  { %3114 = vpow2.f32 %v2458_v43 }
0x1171   :  { %v3109_v40 = vpop.eup %3108 }
0x1172   :  { %v3111_v41 = vpop.eup %3110  ;;  %1755 = vrot.lane.b32.xlu0 %v3109_v40, %s3322_s22 }
0x1173   :  { %1852 = vrot.lane.b32.xlu1 %v3111_v41, %s3322_s22  ;;  %v3113_v44 = vpop.eup %3112 }
0x1174   :  { %v3115_v45 = vpop.eup %3114  ;;  %v1749_v5 = vadd.f32 1.0, %v3113_v44 }
0x1175   :  { %v1846_v25 = vadd.f32 1.0, %v3115_v45 }
0x1176   :  { %3116 = vrcp.f32 %v1749_v5 }
0x1177   :  { %3118 = vrcp.f32 %v1846_v25 }
0x1180   :  { %v3117_v46 = vpop.eup %3116 }
0x1181   :  { %v3119_v48 = vpop.eup %3118  ;;  %v1753_v52 = vmul.f32 %v3117_v46, %v3727_v7 }
0x1182   :  { %v1850_v53 = vmul.f32 %v3119_v48, %v3731_v10 }
0x11e4   :  { %v1756_v47 = vpop.permute.xlu0 %1755 }
0x11e5   :  { %v1853_v49 = vpop.permute.xlu1 %1852  ;;  %v1758_v50 = vmul.f32 %v3117_v46, %v1756_v47 }
0x11e6   :  { %v1855_v51 = vmul.f32 %v3119_v48, %v1853_v49 }
0x11e7   :  { %1760 = vrot.lane.b32.xlu0 %v1758_v50, %s3327_s18 }
0x11e8   :  { %1857 = vrot.lane.b32.xlu1 %v1855_v51, %s3327_s18 }
0x1259   :  { %v1761_v54 = vpop.permute.xlu0 %1760 }
0x125a   :  { %v1858_v55 = vpop.permute.xlu1 %1857  ;;  %v3768_v56 = vadd.f32 %v1761_v54, %v1753_v52 }
0x125b   :  { %v3770_v57 = vadd.f32 %v1858_v55, %v1850_v53 }
0x125c   :  { %3120 = vtanh.f32 %v3768_v56 }
0x125d   :  { %3122 = vtanh.f32 %v3770_v57 }
0x1266   :  { %v3121_v58 = vpop.eup %3120 }
0x1267   :  { %v3123_v59 = vpop.eup %3122  ;;  %1766 = vrot.lane.b32.xlu0 %v3121_v58, %s3322_s22 }
0x1268   :  { %1863 = vrot.lane.b32.xlu1 %v3123_v59, %s3322_s22  ;;  %v2314_v59 = vld [vmem:[#allocation12] sm:$0xff] }
0x12d9   :  { %v1767_v60 = vpop.permute.xlu0 %1766 }
0x12da   :  { %v1864_v62 = vpop.permute.xlu1 %1863  ;;  %v1769_v15 = vmul.f32 %v3117_v46, %v1767_v60  ;;  %v2315_v60 = vld [vmem:[#allocation12 + $0x8] sm:$0xff] }
0x12db   :  { %v1866_v63 = vmul.f32 %v3119_v48, %v1864_v62  ;;  %v3149_v48 = vld [vmem:[%s3847_s6] ss:$0 sm:$0xff] }
0x12dc   :  { %1868 = vrot.lane.b32.xlu0 %v1769_v15, %s3327_s18  ;;  %v2316_v62 = vld [vmem:[#allocation12 + $0x10] sm:$0xff]  ;;  %v3000_v15 = vpack.c.bf16 %v2315_v60, %v2314_v59 }
0x12dd   :  { %1943 = vrot.lane.b32.xlu1 %v1866_v63, %s3327_s18  ;;  %v2317_v63 = vld [vmem:[#allocation12 + $0x18] sm:$0xff] }
0x134e   :  { %v1869_v0 = vpop.permute.xlu0 %1868 }
0x134f   :  { %v1944_v1 = vpop.permute.xlu1 %1943  ;;  %2806 = vmatmul.mubr.msk.f32.vlgmr.msra.gmra.mrb[18].mxu1 %vm303_vm2, %v1869_v0  ;;  %v3003_v0 = vpack.c.bf16 %v2317_v63, %v2316_v62 }
0x1350   :  { %2817 = vmatmul.mubr.msk.f32.vlgmr.msra.gmra.mrb[24].mxu0 %vm303_vm2, %v1944_v1  ;;  %2983 = vmatpush3.bf16.msra.mxu1 %v3514_v29 }
0x1351   :  { %2984 = vmatprep.subr.bf16.mxu1 %v3323_v19  ;;  %2827 = vmatprep.mubr.msk.f32.mxu1 %vm3324_vm1, %v3325_v22 }
0x1352   :  { %2989 = vmatpush3.bf16.msra.mxu0 %v3547_v61  ;;  %2838 = vmatprep.mubr.msk.f32.mxu0 %vm3324_vm1, %v3325_v22 }
0x1353   :  { %2990 = vmatprep.subr.bf16.mxu0 %v3323_v19 }
0x1354   :  { %2986 = vmatpush3.bf16.msra.mxu1 %v3518_v33 }
0x1355   :  { %2993 = vmatprep.subr.bf16.mxu1 %v3323_v19 }
0x1356   :  { %2992 = vmatpush3.bf16.msra.mxu0 %v3555_v8 }
0x1357   :  { %2828 = vmatmul.mubr.msk.f32.vlgmr.msra.gmra.mrb[20].mxu1 %vm303_vm2, %v1944_v1  ;;  %2999 = vmatprep.subr.bf16.mxu0 %v3323_v19 }
0x1358   :  { %2995 = vmatpush3.bf16.msra.mxu1 %v3500_v20  ;;  %2849 = vmatprep.mubr.msk.f32.mxu1 %vm3324_vm1, %v3325_v22  ;;  %v259_v20 = vadd.f32 %v3148_v4, %v3581_v24 }
0x1359   :  { %2996 = vmatprep.subr.bf16.mxu1 %v3323_v19 }
0x135c   :  { %2998 = vmatpush3.bf16.msra.mxu1 %v3506_v23 }
0x1422   :  { %v1938_v29 = vpop.f32.mrb[18].mxu1 }
0x1423   :  { %v2013_v61 = vpop.f32.mrb[24].mxu0  ;;  %v2807_v33 = vpop.f32.mrb[19].mxu1 }
0x1424   :  { %v2014_v2 = vadd.f32 %v2013_v61, %v1938_v29  ;;  %v2818_v3 = vpop.f32.mrb[25].mxu0 }
0x1426   :  { %v2017_v8 = vadd.f32 %v3536_v37, %v2014_v2  ;;  %v2467_v2 = vld [vmem:[%s3849_s8] ss:$0 sm:$0xff] }
0x1428   :  { %3124 = vtanh.f32 %v2017_v8  ;;  %v2461_v10 = vmul.f32 -1.442695, %v2017_v8 }
0x142a   :  { %v2110_v6 = vpop.f32.mrb[20].mxu1 }
0x142b   :  { %v2114_v7 = vadd.f32 %v2110_v6, %v259_v20  ;;  %v2829_v9 = vpop.f32.mrb[21].mxu1 }
0x142d   :  { %3126 = vtanh.f32 %v2114_v7  ;;  %v2463_v37 = vmul.f32 -1.442695, %v2114_v7 }
0x142e   :  { %3128 = vpow2.f32 %v2461_v10 }
0x142f   :  { %3130 = vpow2.f32 %v2463_v37 }
0x1432   :  { %v3125_v16 = vpop.eup %3124 }
0x1433   :  { %2027 = vrot.lane.b32.xlu0 %v3125_v16, %s3322_s22 }
0x1437   :  { %v3127_v23 = vpop.eup %3126 }
0x1438   :  { %2124 = vrot.lane.b32.xlu1 %v3127_v23, %s3322_s22  ;;  %v3129_v11 = vpop.eup %3128 }
0x1439   :  { %v2021_v12 = vadd.f32 1.0, %v3129_v11  ;;  %v3131_v14 = vpop.eup %3130 }
0x143a   :  { %v2118_v17 = vadd.f32 1.0, %v3131_v14 }
0x143b   :  { %3132 = vrcp.f32 %v2021_v12 }
0x143c   :  { %3134 = vrcp.f32 %v2118_v17 }
0x1445   :  { %v3133_v24 = vpop.eup %3132 }
0x1446   :  { %v3135_v26 = vpop.eup %3134  ;;  %v2025_v30 = vmul.f32 %v3133_v24, %v3768_v56 }
0x1447   :  { %v2122_v34 = vmul.f32 %v3135_v26, %v3770_v57 }
0x14a5   :  { %v2028_v18 = vpop.permute.xlu0 %2027 }
0x14a6   :  { %v2030_v21 = vmul.f32 %v3133_v24, %v2028_v18 }
0x14a8   :  { %2032 = vrot.lane.b32.xlu0 %v2030_v21, %s3327_s18 }
0x14aa   :  { %v2125_v27 = vpop.permute.xlu1 %2124 }
0x14ab   :  { %v2127_v28 = vmul.f32 %v3135_v26, %v2125_v27 }
0x14ad   :  { %2129 = vrot.lane.b32.xlu1 %v2127_v28, %s3327_s18 }
0x151a   :  { %v2033_v31 = vpop.permute.xlu0 %2032 }
0x151b   :  { %v2035_v32 = vadd.f32 %v2033_v31, %v2025_v30 }
0x151d   :  { %3136 = vtanh.f32 %v2035_v32 }
0x151f   :  { %v2130_v35 = vpop.permute.xlu1 %2129 }
0x1520   :  { %v2132_v36 = vadd.f32 %v2130_v35, %v2122_v34 }
0x1522   :  { %3138 = vtanh.f32 %v2132_v36 }
0x1527   :  { %v3137_v13 = vpop.eup %3136 }
0x1528   :  { %2038 = vrot.lane.b32.xlu0 %v3137_v13, %s3322_s22 }
0x152c   :  { %v3139_v38 = vpop.eup %3138 }
0x152d   :  { %2135 = vrot.lane.b32.xlu1 %v3139_v38, %s3322_s22 }
0x159a   :  { %v2039_v39 = vpop.permute.xlu0 %2038 }
0x159b   :  { %v2041_v40 = vmul.f32 %v3133_v24, %v2039_v39 }
0x159d   :  { %2140 = vrot.lane.b32.xlu0 %v2041_v40, %s3327_s18 }
0x159f   :  { %v2136_v41 = vpop.permute.xlu1 %2135 }
0x15a0   :  { %v2138_v42 = vmul.f32 %v3135_v26, %v2136_v41 }
0x15a2   :  { %2215 = vrot.lane.b32.xlu1 %v2138_v42, %s3327_s18 }
0x160f   :  { %v2141_v43 = vpop.permute.xlu0 %2140 }
0x1610   :  { %2839 = vmatmul.mubr.msk.f32.vlgmr.msra.gmra.mrb[26].mxu0 %vm303_vm2, %v2141_v43 }
0x1611   :  { %2860 = vmatprep.mubr.msk.f32.mxu0 %vm3324_vm1, %v3325_v22  ;;  %3001 = vmatpush3.bf16.msra.mxu0 %v3000_v15 }
0x1612   :  { %3002 = vmatprep.subr.bf16.mxu0 %v3323_v19 }
0x1614   :  { %v2216_v44 = vpop.permute.xlu1 %2215 }
0x1615   :  { %2850 = vmatmul.mubr.msk.f32.vlgmr.msra.gmra.mrb[22].mxu1 %vm303_vm2, %v2216_v44  ;;  %3004 = vmatpush3.bf16.msra.mxu0 %v3003_v0 }
0x16e3   :  { %v2210_v45 = vpop.f32.mrb[26].mxu0 }
0x16e4   :  { %v2840_v5 = vpop.f32.mrb[27].mxu0 }
0x16e8   :  { %v2285_v25 = vpop.f32.mrb[22].mxu1 }
0x16e9   :  { %v2286_v46 = vadd.f32 %v2285_v25, %v2210_v45  ;;  %v2851_v47 = vpop.f32.mrb[23].mxu1 }
0x16eb   :  { %v2289_v49 = vadd.f32 %v3149_v48, %v2286_v46 }
0x16ed   :  { %3140 = vtanh.f32 %v2289_v49  ;;  %v2466_v51 = vmul.f32 -1.442695, %v2289_v49 }
0x16ef   :  { %3142 = vpow2.f32 %v2466_v51 }
0x16f7   :  { %v3141_v50 = vpop.eup %3140 }
0x16f8   :  { %2299 = vrot.lane.b32.xlu0 %v3141_v50, %s3322_s22 }
0x16f9   :  { %v3143_v22 = vpop.eup %3142 }
0x16fa   :  { %v2293_v52 = vadd.f32 1.0, %v3143_v22 }
0x16fc   :  { %3144 = vrcp.f32 %v2293_v52 }
0x1706   :  { %v3145_v53 = vpop.eup %3144 }
0x1707   :  { %v2297_v56 = vmul.f32 %v3145_v53, %v2035_v32 }
0x176a   :  { %v2300_v54 = vpop.permute.xlu0 %2299 }
0x176b   :  { %v2302_v55 = vmul.f32 %v3145_v53, %v2300_v54 }
0x176d   :  { %2304 = vrot.lane.b32.xlu1 %v2302_v55, %s3327_s18 }
0x17df   :  { %v2305_v57 = vpop.permute.xlu1 %2304 }
0x17e0   :  { %v2307_v58 = vadd.f32 %v2305_v57, %v2297_v56 }
0x17e2   :  { %3146 = vtanh.f32 %v2307_v58 }
0x17ec   :  { %v3147_v1 = vpop.eup %3146 }
0x17ed   :  { %2310 = vrot.lane.b32.xlu0 %v3147_v1, %s3322_s22 }
0x185f   :  { %v2311_v29 = vpop.permute.xlu0 %2310 }
0x1860   :  { %v2313_v61 = vmul.f32 %v3145_v53, %v2311_v29 }
0x1862   :  { %2326 = vrot.lane.b32.xlu1 %v2313_v61, %s3327_s18 }
0x18d4   :  { %v2327_v33 = vpop.permute.xlu1 %2326 }
0x18d5   :  { %2861 = vmatmul.mubr.msk.f32.vlgmr.msra.gmra.mrb[28].mxu0 %vm303_vm2, %v2327_v33 }
0x19a8   :  { %v2396_v3 = vpop.f32.mrb[28].mxu0 }
0x19a9   :  { %v2397_v8 = vadd.f32 %v2467_v2, %v2396_v3  ;;  %v2862_v19 = vpop.f32.mrb[29].mxu0 }
0x19ab   :  { %2400 = vst [vmem:[#allocation14] sm:$0xff] %v2397_v8 }
0x19ac   :  { %3293 = shalt.err (!%p3290_p10)
}
0x19ad   :  { %s3294_s28 = scalar_lea.hbm %s3850_s9, 128 }
0x19ae   :  { %p3295_p11 = scmp.ne.s32.totalorder %s3850_s9, %s3294_s28  ;;  %p3298_p12 = scmp.lt.u32.totalorder %s3294_s28, %s3850_s9 }
0x19b0   :  { %p3300_p13 = pnand %p3298_p12, %p3295_p11 }
0x19b2   :  { %3303 = shalt.err (!%p3300_p13)
}
0x19b3   :  { %2410 = dma.vmem_to_hbm [thread:$0]  %s2408_s12, 128, %s3850_s9, [#allocation5]  }
0x19b4   :  { %3312 = dma.done.wait [#allocation5], 128  }
0x19b5   :  { %3313 = vsyncadd [#allocation5], 4294967168 }
0x19b6   :  { %2414 = vsyncpa [#allocation4], 1 }
0x19b7   :  { %2415 = vsyncpa [#allocation7], 1 }
0x19b8   :  { %2416 = vsyncpa [#allocation10], 1 }
0x19b9   :  { %2417 = vsyncpa [#allocation13], 1 }
0x19ba   :  { %2418 = vsyncpa [#allocation5], 1 }

</bundles_post_ra>
